<compile_context>
chip_gen: v7x
topology: tpu7x:2x2x1
jax: 0.10.0
libtpu: 0.0.40
codegen_flags: <defaults>
</compile_context>

<pallas_src>
import functools

import jax
import jax.numpy as jnp
from jax import lax
from jax.experimental import pallas as pl
from jax.experimental.pallas import tpu as pltpu

REDUCTION = 16  # hard-coded in CALayer


# ------------------------------ Pallas kernel ------------------------------ #
def _residual_chain_kernel(x_ref, convw_ref, convb_ref, alpha_ref,
                           caw1_ref, cab1_ref, caw2_ref, cab2_ref,
                           mergew_ref, mergeb_ref,
                           o_ref, pad_ref, col_ref, *, H, W, P):
    S = H * W
    C = x_ref.shape[2]
    blk = pl.program_id(1)

    # First block for this image: seed the resident activation (the output VMEM tile)
    # with x, and zero the pad rows of the flat padded scratch (they never change).
    @pl.when(blk == 0)
    def _():
        o_ref[...] = x_ref[...]
        zpad = jnp.zeros((P, C), jnp.bfloat16)
        pad_ref[0:P, :] = zpad
        pad_ref[P + S:P + S + P, :] = zpad

    act = o_ref[0]                                     # (S, C) f32, resident across blocks
    pad_ref[P:P + S, :] = act.astype(jnp.bfloat16)     # rewrite only the data rows

    # Column masks for the +-1 horizontal taps, hoisted and already (S, C).
    col = lax.broadcasted_iota(jnp.int32, (S, C), 0) % W
    not_last = col != (W - 1)          # valid when reading the (w+1) neighbour
    not_first = col != 0               # valid when reading the (w-1) neighbour

    # Build the (S, 9C) bf16 im2col scratch: 9 shifted reads of the padded copy,
    # masked while writing into lane-blocks, then ONE (S,9C)@(9C,3C) MXU matmul.
    k = 0
    for dy in (-1, 0, 1):
        for dx in (-1, 0, 1):
            d = dy * W + dx
            xs = pad_ref[P + d:P + d + S, :]           # (S, C) bf16 shifted view
            if dx == 1:
                xs = jnp.where(not_last, xs, 0.0)
            elif dx == -1:
                xs = jnp.where(not_first, xs, 0.0)
            col_ref[:, k * C:(k + 1) * C] = xs
            k += 1

    y = jnp.dot(col_ref[...], convw_ref[blk],          # (S, 3C) f32
                preferred_element_type=jnp.float32)

    # conv bias + PeLU (elu(y) * alpha), all three branches at once
    y = y + convb_ref[blk]
    y = jnp.where(y > 0, y, jnp.exp(jnp.minimum(y, 0.0)) - 1.0) * alpha_ref[blk]

    # CALayer (squeeze-excite) for all branches via block-diagonal lane-dense weights
    pooled = jnp.mean(y, axis=0, keepdims=True)                                   # (1, 3C)
    h = jnp.sum(caw1_ref[blk] * pooled, axis=1, keepdims=True) + cab1_ref[blk]    # (3Cr, 1)
    h = jnp.maximum(h, 0.0)
    s = jnp.sum(caw2_ref[blk] * h, axis=0, keepdims=True) + cab2_ref[blk]         # (1, 3C)
    s = 1.0 / (1.0 + jnp.exp(-s))
    y = y * s

    # 1x1 merge conv + residual
    out = jnp.dot(y.astype(jnp.bfloat16), mergew_ref[blk],
                  preferred_element_type=jnp.float32)
    o_ref[0] = (out + mergeb_ref[blk] + act).astype(o_ref.dtype)


# ------------------------------- JAX wrapper -------------------------------- #
def feature_extractor_pallas(x_nchw, stacked):
    N, C, H, W = x_nchw.shape
    S = H * W
    P = max(32, ((W + 1 + 31) // 32) * 32)   # flat zero-pad rows per side, 32-aligned (bf16 packing)
    num_blocks = stacked['conv_w'].shape[0]

    xf = jnp.transpose(x_nchw, (0, 2, 3, 1)).reshape(N, S, C)

    def resident(arr):
        # Whole stacked weight lives in VMEM for the whole grid (constant index_map).
        nd = arr.ndim
        return pl.BlockSpec(arr.shape, lambda n, b: (0,) * nd)

    out = pl.pallas_call(
        functools.partial(_residual_chain_kernel, H=H, W=W, P=P),
        out_shape=jax.ShapeDtypeStruct((N, S, C), x_nchw.dtype),
        grid=(N, num_blocks),
        in_specs=[
            pl.BlockSpec((1, S, C), lambda n, b: (n, 0, 0)),     # x (only read at b==0)
            resident(stacked['conv_w']), resident(stacked['conv_b']), resident(stacked['alpha']),
            resident(stacked['ca_w1']), resident(stacked['ca_b1']),
            resident(stacked['ca_w2']), resident(stacked['ca_b2']),
            resident(stacked['merge_w']), resident(stacked['merge_b']),
        ],
        out_specs=pl.BlockSpec((1, S, C), lambda n, b: (n, 0, 0)),
        scratch_shapes=[
            pltpu.VMEM((S + 2 * P, C), jnp.bfloat16),   # flat zero-padded activation copy
            pltpu.VMEM((S, 9 * C), jnp.bfloat16),       # im2col buffer
        ],
        compiler_params=pltpu.CompilerParams(
            dimension_semantics=("parallel", "arbitrary")),
    )(xf, stacked['conv_w'], stacked['conv_b'], stacked['alpha'],
      stacked['ca_w1'], stacked['ca_b1'], stacked['ca_w2'], stacked['ca_b2'],
      stacked['merge_w'], stacked['merge_b'])

    return jnp.transpose(out.reshape(N, H, W, C), (0, 3, 1, 2))


# --------------------------- parameter construction ------------------------- #
def init_block_params(key, C):
    """PyTorch-layout parameters for one ResidualBlock."""
    Cr = C // REDUCTION
    assert Cr >= 1, "in_channels must be >= 16 (CALayer hard-codes reduction=16)"
    ks = jax.random.split(key, 9)
    return dict(
        conv_w=jax.random.normal(ks[0], (3, C, C, 3, 3), jnp.float32) * 0.05,  # (branch,Cout,Cin,kh,kw)
        conv_b=jax.random.normal(ks[1], (3, C), jnp.float32) * 0.05,
        alpha=1.0 + 0.1 * jax.random.normal(ks[2], (3,), jnp.float32),          # PeLU scalar per branch
        ca_w1=jax.random.normal(ks[3], (3, Cr, C), jnp.float32) * 0.05,         # (branch,Cr,C)
        ca_b1=jax.random.normal(ks[4], (3, Cr), jnp.float32) * 0.05,
        ca_w2=jax.random.normal(ks[5], (3, C, Cr), jnp.float32) * 0.05,         # (branch,C,Cr)
        ca_b2=jax.random.normal(ks[6], (3, C), jnp.float32) * 0.05,
        merge_w=jax.random.normal(ks[7], (C, 3 * C), jnp.float32) * 0.05,       # (Cout, 3C)
        merge_b=jax.random.normal(ks[8], (C,), jnp.float32) * 0.05,
    )


def pack_block(p):
    """Convert one block's PyTorch-layout params into the fused kernel layout."""
    C = p['conv_b'].shape[1]
    Cr = p['ca_b1'].shape[1]
    hwio = jnp.transpose(p['conv_w'], (0, 3, 4, 2, 1))       # (branch, kh, kw, Cin, Cout)
    conv_w = jnp.concatenate([hwio[b].reshape(9 * C, C) for b in range(3)], axis=1)  # (9C, 3C)
    # Block-diagonal, lane-dense (3Cr, 3C) squeeze-excite weights.
    w1 = jnp.zeros((3 * Cr, 3 * C), jnp.float32)
    w2 = jnp.zeros((3 * Cr, 3 * C), jnp.float32)
    for b in range(3):
        w1 = w1.at[b * Cr:(b + 1) * Cr, b * C:(b + 1) * C].set(p['ca_w1'][b])       # (Cr, C)
        w2 = w2.at[b * Cr:(b + 1) * Cr, b * C:(b + 1) * C].set(p['ca_w2'][b].T)     # (Cr, C)
    return dict(
        conv_w=conv_w.astype(jnp.bfloat16),
        conv_b=p['conv_b'].reshape(1, 3 * C),
        alpha=jnp.repeat(p['alpha'], C).reshape(1, 3 * C),
        ca_w1=w1, ca_b1=p['ca_b1'].reshape(3 * Cr, 1),
        ca_w2=w2, ca_b2=p['ca_b2'].reshape(1, 3 * C),
        merge_w=p['merge_w'].T.astype(jnp.bfloat16),          # (3C, C)
        merge_b=p['merge_b'].reshape(1, C),
    )


def stack_blocks(packed_blocks):
    return {k: jnp.stack([blk[k] for blk in packed_blocks], axis=0)
            for k in packed_blocks[0]}


# ----------------------------- pure-JAX reference --------------------------- #
def ref_block_forward(x, p):   # x NHWC, f32 throughout
    hwio = jnp.transpose(p['conv_w'], (0, 3, 4, 2, 1))
    branches = []
    for b in range(3):
        y = lax.conv_general_dilated(x, hwio[b], (1, 1), 'SAME',
                                     dimension_numbers=('NHWC', 'HWIO', 'NHWC'))
        y = y + p['conv_b'][b]
        y = jnp.where(y > 0, y, jnp.exp(jnp.minimum(y, 0.0)) - 1.0) * p['alpha'][b]
        pooled = jnp.mean(y, axis=(1, 2), keepdims=True)                         # (N,1,1,C)
        h = jnp.maximum(jnp.einsum('nijc,rc->nijr', pooled, p['ca_w1'][b]) + p['ca_b1'][b], 0.0)
        s = jnp.einsum('nijr,cr->nijc', h, p['ca_w2'][b]) + p['ca_b2'][b]
        s = 1.0 / (1.0 + jnp.exp(-s))
        branches.append(y * s)
    merged = jnp.concatenate(branches, axis=-1)
    out = jnp.einsum('nhwk,ck->nhwc', merged, p['merge_w']) + p['merge_b']
    return out + x


def ref_feature_extractor(x_nchw, blocks):
    x = jnp.transpose(x_nchw, (0, 2, 3, 1))
    for p in blocks:
        x = ref_block_forward(x, p)
    return jnp.transpose(x, (0, 3, 1, 2))


# ------------------------------------ main ----------------------------------- #
if __name__ == "__main__":
    N, C, H, W = 2, 32, 8, 8          # C >= 16 because CALayer hard-codes reduction=16
    num_blocks = 2

    key = jax.random.PRNGKey(0)
    kx, kp = jax.random.split(key)
    x = jax.random.normal(kx, (N, C, H, W), jnp.float32)      # NCHW, like PyTorch

    block_keys = jax.random.split(kp, num_blocks)
    blocks = [init_block_params(block_keys[i], C) for i in range(num_blocks)]
    stacked = stack_blocks([pack_block(p) for p in blocks])

    out = feature_extractor_pallas(x, stacked)
    out = jax.block_until_ready(out)

    ref = ref_feature_extractor(x, blocks)
    assert out.shape == (N, C, H, W)
    max_err = float(jnp.max(jnp.abs(out - ref)))
    # bf16 conv/merge matmuls with f32 accumulation -> relaxed (but honest) tolerance.
    assert jnp.allclose(out, ref, atol=5e-2, rtol=5e-2), f"max abs err {max_err}"

    print("KERNEL_OK")
</pallas_src>

<mosaic_0001>
module attributes {stable_mosaic.version = 11 : i64} {
  func.func @_residual_chain_kernel(%arg0: i32, %arg1: i32, %arg2: memref<1x64x32xf32, #tpu.memory_space<vmem>>, %arg3: memref<2x288x96xbf16, #tpu.memory_space<vmem>>, %arg4: memref<2x1x96xf32, #tpu.memory_space<vmem>>, %arg5: memref<2x1x96xf32, #tpu.memory_space<vmem>>, %arg6: memref<2x6x96xf32, #tpu.memory_space<vmem>>, %arg7: memref<2x6x1xf32, #tpu.memory_space<vmem>>, %arg8: memref<2x6x96xf32, #tpu.memory_space<vmem>>, %arg9: memref<2x1x96xf32, #tpu.memory_space<vmem>>, %arg10: memref<2x96x32xbf16, #tpu.memory_space<vmem>>, %arg11: memref<2x1x32xf32, #tpu.memory_space<vmem>>, %arg12: memref<1x64x32xf32, #tpu.memory_space<vmem>>, %arg13: memref<128x32xbf16, #tpu.memory_space<vmem>>, %arg14: memref<64x288xbf16, #tpu.memory_space<vmem>>) attributes {dimension_semantics = [#tpu.dimension_semantics<parallel>, #tpu.dimension_semantics<arbitrary>], iteration_bounds = array<i64: 2, 2>, scalar_prefetch = 0 : i64, scratch_operands = 2 : i64, tpu.core_type = #tpu.core_type<tc>, window_params = [{transform_indices = @transform_0, window_bounds = array<i64: 1, 64, 32>}, {pipeline_mode = #tpu.pipeline_mode<synchronous>, transform_indices = @transform_1, window_bounds = array<i64: 2, 288, 96>}, {pipeline_mode = #tpu.pipeline_mode<synchronous>, transform_indices = @transform_2, window_bounds = array<i64: 2, 1, 96>}, {pipeline_mode = #tpu.pipeline_mode<synchronous>, transform_indices = @transform_3, window_bounds = array<i64: 2, 1, 96>}, {pipeline_mode = #tpu.pipeline_mode<synchronous>, transform_indices = @transform_4, window_bounds = array<i64: 2, 6, 96>}, {pipeline_mode = #tpu.pipeline_mode<synchronous>, transform_indices = @transform_5, window_bounds = array<i64: 2, 6, 1>}, {pipeline_mode = #tpu.pipeline_mode<synchronous>, transform_indices = @transform_6, window_bounds = array<i64: 2, 6, 96>}, {pipeline_mode = #tpu.pipeline_mode<synchronous>, transform_indices = @transform_7, window_bounds = array<i64: 2, 1, 96>}, {pipeline_mode = #tpu.pipeline_mode<synchronous>, transform_indices = @transform_8, window_bounds = array<i64: 2, 96, 32>}, {pipeline_mode = #tpu.pipeline_mode<synchronous>, transform_indices = @transform_9, window_bounds = array<i64: 2, 1, 32>}, {transform_indices = @transform_10, window_bounds = array<i64: 1, 64, 32>}]} {
    %c0_i32 = arith.constant 0 : i32
    %0 = arith.cmpi eq, %arg1, %c0_i32 : i32
    %1 = arith.extui %0 : i1 to i32
    %c0_i32_0 = arith.constant 0 : i32
    %2 = arith.cmpi ne, %1, %c0_i32_0 : i32
    scf.if %2 {
      %c0_71 = arith.constant 0 : index
      %c0_72 = arith.constant 0 : index
      %c0_73 = arith.constant 0 : index
      %138 = vector.load %arg2[%c0_71, %c0_72, %c0_73] : memref<1x64x32xf32, #tpu.memory_space<vmem>>, vector<1x64x32xf32>
      %c0_74 = arith.constant 0 : index
      %c0_75 = arith.constant 0 : index
      %c0_76 = arith.constant 0 : index
      %139 = vector.load %arg12[%c0_74, %c0_75, %c0_76] : memref<1x64x32xf32, #tpu.memory_space<vmem>>, vector<1x64x32xf32>
      tpu.vector_store %arg12[%c0_74, %c0_75, %c0_76], %138 {strides = array<i32>} : memref<1x64x32xf32, #tpu.memory_space<vmem>>, vector<1x64x32xf32>,
      %cst_77 = arith.constant 0.000000e+00 : bf16
      %140 = vector.broadcast %cst_77 : bf16 to vector<32x32xbf16>
      %c0_78 = arith.constant 0 : index
      %c0_79 = arith.constant 0 : index
      %141 = vector.load %arg13[%c0_78, %c0_79] : memref<128x32xbf16, #tpu.memory_space<vmem>>, vector<32x32xbf16>
      tpu.vector_store %arg13[%c0_78, %c0_79], %140 {strides = array<i32>} : memref<128x32xbf16, #tpu.memory_space<vmem>>, vector<32x32xbf16>,
      %c96_80 = arith.constant 96 : index
      %c0_81 = arith.constant 0 : index
      %142 = vector.load %arg13[%c96_80, %c0_81] : memref<128x32xbf16, #tpu.memory_space<vmem>>, vector<32x32xbf16>
      tpu.vector_store %arg13[%c96_80, %c0_81], %140 {strides = array<i32>} : memref<128x32xbf16, #tpu.memory_space<vmem>>, vector<32x32xbf16>,
    } else {
    }
    %c0 = arith.constant 0 : index
    %c0_1 = arith.constant 0 : index
    %c0_2 = arith.constant 0 : index
    %3 = vector.load %arg12[%c0, %c0_1, %c0_2] : memref<1x64x32xf32, #tpu.memory_space<vmem>>, vector<1x64x32xf32>
    %4 = vector.shape_cast %3 : vector<1x64x32xf32> to vector<64x32xf32>
    %5 = arith.truncf %4 : vector<64x32xf32> to vector<64x32xbf16>
    %c32 = arith.constant 32 : index
    %c0_3 = arith.constant 0 : index
    %6 = vector.load %arg13[%c32, %c0_3] : memref<128x32xbf16, #tpu.memory_space<vmem>>, vector<64x32xbf16>
    tpu.vector_store %arg13[%c32, %c0_3], %5 {strides = array<i32>} : memref<128x32xbf16, #tpu.memory_space<vmem>>, vector<64x32xbf16>,
    %7 = tpu.iota {dimensions = array<i32: 0>} : vector<64x32xi32>
    %c8_i32 = arith.constant 8 : i32
    %c0_i32_4 = arith.constant 0 : i32
    %8 = arith.cmpi eq, %c8_i32, %c0_i32_4 : i32
    %c1_i32 = arith.constant 1 : i32
    %9 = arith.select %8, %c1_i32, %c8_i32 : i32
    %10 = vector.broadcast %9 : i32 to vector<64x32xi32>
    %11 = arith.remsi %7, %10 : vector<64x32xi32>
    %c0_i32_5 = arith.constant 0 : i32
    %12 = vector.broadcast %c0_i32_5 : i32 to vector<64x32xi32>
    %13 = arith.cmpi ne, %11, %12 : vector<64x32xi32>
    %c0_i32_6 = arith.constant 0 : i32
    %14 = vector.broadcast %c0_i32_6 : i32 to vector<64x32xi32>
    %15 = arith.cmpi slt, %11, %14 : vector<64x32xi32>
    %c0_i32_7 = arith.constant 0 : i32
    %16 = arith.cmpi slt, %9, %c0_i32_7 : i32
    %17 = vector.broadcast %16 : i1 to vector<64x32xi1>
    %18 = vector.broadcast %17 : vector<64x32xi1> to vector<64x32xi1>
    %19 = arith.xori %15, %18 : vector<64x32xi1>
    %20 = arith.andi %19, %13 : vector<64x32xi1>
    %21 = vector.broadcast %9 : i32 to vector<64x32xi32>
    %22 = arith.addi %11, %21 : vector<64x32xi32>
    %23 = arith.select %20, %22, %11 : vector<64x32xi1>, vector<64x32xi32>
    %c7_i32 = arith.constant 7 : i32
    %24 = vector.broadcast %c7_i32 : i32 to vector<64x32xi32>
    %25 = arith.cmpi ne, %23, %24 : vector<64x32xi32>
    %c0_i32_8 = arith.constant 0 : i32
    %26 = vector.broadcast %c0_i32_8 : i32 to vector<64x32xi32>
    %27 = arith.cmpi ne, %23, %26 : vector<64x32xi32>
    %c23 = arith.constant 23 : index
    %c0_9 = arith.constant 0 : index
    %28 = vector.load %arg13[%c23, %c0_9] : memref<128x32xbf16, #tpu.memory_space<vmem>>, vector<64x32xbf16>
    %cst = arith.constant 0.000000e+00 : f32
    %29 = arith.truncf %cst : f32 to bf16
    %30 = vector.broadcast %29 : bf16 to vector<64x32xbf16>
    %31 = arith.select %27, %28, %30 : vector<64x32xi1>, vector<64x32xbf16>
    %c0_10 = arith.constant 0 : index
    %c0_11 = arith.constant 0 : index
    %32 = vector.load %arg14[%c0_10, %c0_11] : memref<64x288xbf16, #tpu.memory_space<vmem>>, vector<64x32xbf16>
    tpu.vector_store %arg14[%c0_10, %c0_11], %31 {strides = array<i32>} : memref<64x288xbf16, #tpu.memory_space<vmem>>, vector<64x32xbf16>,
    %c24 = arith.constant 24 : index
    %c0_12 = arith.constant 0 : index
    %33 = vector.load %arg13[%c24, %c0_12] : memref<128x32xbf16, #tpu.memory_space<vmem>>, vector<64x32xbf16>
    %c0_13 = arith.constant 0 : index
    %c32_14 = arith.constant 32 : index
    %34 = vector.load %arg14[%c0_13, %c32_14] : memref<64x288xbf16, #tpu.memory_space<vmem>>, vector<64x32xbf16>
    tpu.vector_store %arg14[%c0_13, %c32_14], %33 {strides = array<i32>} : memref<64x288xbf16, #tpu.memory_space<vmem>>, vector<64x32xbf16>,
    %c25 = arith.constant 25 : index
    %c0_15 = arith.constant 0 : index
    %35 = vector.load %arg13[%c25, %c0_15] : memref<128x32xbf16, #tpu.memory_space<vmem>>, vector<64x32xbf16>
    %cst_16 = arith.constant 0.000000e+00 : f32
    %36 = arith.truncf %cst_16 : f32 to bf16
    %37 = vector.broadcast %36 : bf16 to vector<64x32xbf16>
    %38 = arith.select %25, %35, %37 : vector<64x32xi1>, vector<64x32xbf16>
    %c0_17 = arith.constant 0 : index
    %c64 = arith.constant 64 : index
    %39 = vector.load %arg14[%c0_17, %c64] : memref<64x288xbf16, #tpu.memory_space<vmem>>, vector<64x32xbf16>
    tpu.vector_store %arg14[%c0_17, %c64], %38 {strides = array<i32>} : memref<64x288xbf16, #tpu.memory_space<vmem>>, vector<64x32xbf16>,
    %c31 = arith.constant 31 : index
    %c0_18 = arith.constant 0 : index
    %40 = vector.load %arg13[%c31, %c0_18] : memref<128x32xbf16, #tpu.memory_space<vmem>>, vector<64x32xbf16>
    %cst_19 = arith.constant 0.000000e+00 : f32
    %41 = arith.truncf %cst_19 : f32 to bf16
    %42 = vector.broadcast %41 : bf16 to vector<64x32xbf16>
    %43 = arith.select %27, %40, %42 : vector<64x32xi1>, vector<64x32xbf16>
    %c0_20 = arith.constant 0 : index
    %c96 = arith.constant 96 : index
    %44 = vector.load %arg14[%c0_20, %c96] : memref<64x288xbf16, #tpu.memory_space<vmem>>, vector<64x32xbf16>
    tpu.vector_store %arg14[%c0_20, %c96], %43 {strides = array<i32>} : memref<64x288xbf16, #tpu.memory_space<vmem>>, vector<64x32xbf16>,
    %c32_21 = arith.constant 32 : index
    %c0_22 = arith.constant 0 : index
    %45 = vector.load %arg13[%c32_21, %c0_22] : memref<128x32xbf16, #tpu.memory_space<vmem>>, vector<64x32xbf16>
    %c0_23 = arith.constant 0 : index
    %c128 = arith.constant 128 : index
    %46 = vector.load %arg14[%c0_23, %c128] : memref<64x288xbf16, #tpu.memory_space<vmem>>, vector<64x32xbf16>
    tpu.vector_store %arg14[%c0_23, %c128], %45 {strides = array<i32>} : memref<64x288xbf16, #tpu.memory_space<vmem>>, vector<64x32xbf16>,
    %c33 = arith.constant 33 : index
    %c0_24 = arith.constant 0 : index
    %47 = vector.load %arg13[%c33, %c0_24] : memref<128x32xbf16, #tpu.memory_space<vmem>>, vector<64x32xbf16>
    %cst_25 = arith.constant 0.000000e+00 : f32
    %48 = arith.truncf %cst_25 : f32 to bf16
    %49 = vector.broadcast %48 : bf16 to vector<64x32xbf16>
    %50 = arith.select %25, %47, %49 : vector<64x32xi1>, vector<64x32xbf16>
    %c0_26 = arith.constant 0 : index
    %c160 = arith.constant 160 : index
    %51 = vector.load %arg14[%c0_26, %c160] : memref<64x288xbf16, #tpu.memory_space<vmem>>, vector<64x32xbf16>
    tpu.vector_store %arg14[%c0_26, %c160], %50 {strides = array<i32>} : memref<64x288xbf16, #tpu.memory_space<vmem>>, vector<64x32xbf16>,
    %c39 = arith.constant 39 : index
    %c0_27 = arith.constant 0 : index
    %52 = vector.load %arg13[%c39, %c0_27] : memref<128x32xbf16, #tpu.memory_space<vmem>>, vector<64x32xbf16>
    %cst_28 = arith.constant 0.000000e+00 : f32
    %53 = arith.truncf %cst_28 : f32 to bf16
    %54 = vector.broadcast %53 : bf16 to vector<64x32xbf16>
    %55 = arith.select %27, %52, %54 : vector<64x32xi1>, vector<64x32xbf16>
    %c0_29 = arith.constant 0 : index
    %c192 = arith.constant 192 : index
    %56 = vector.load %arg14[%c0_29, %c192] : memref<64x288xbf16, #tpu.memory_space<vmem>>, vector<64x32xbf16>
    tpu.vector_store %arg14[%c0_29, %c192], %55 {strides = array<i32>} : memref<64x288xbf16, #tpu.memory_space<vmem>>, vector<64x32xbf16>,
    %c40 = arith.constant 40 : index
    %c0_30 = arith.constant 0 : index
    %57 = vector.load %arg13[%c40, %c0_30] : memref<128x32xbf16, #tpu.memory_space<vmem>>, vector<64x32xbf16>
    %c0_31 = arith.constant 0 : index
    %c224 = arith.constant 224 : index
    %58 = vector.load %arg14[%c0_31, %c224] : memref<64x288xbf16, #tpu.memory_space<vmem>>, vector<64x32xbf16>
    tpu.vector_store %arg14[%c0_31, %c224], %57 {strides = array<i32>} : memref<64x288xbf16, #tpu.memory_space<vmem>>, vector<64x32xbf16>,
    %c41 = arith.constant 41 : index
    %c0_32 = arith.constant 0 : index
    %59 = vector.load %arg13[%c41, %c0_32] : memref<128x32xbf16, #tpu.memory_space<vmem>>, vector<64x32xbf16>
    %cst_33 = arith.constant 0.000000e+00 : f32
    %60 = arith.truncf %cst_33 : f32 to bf16
    %61 = vector.broadcast %60 : bf16 to vector<64x32xbf16>
    %62 = arith.select %25, %59, %61 : vector<64x32xi1>, vector<64x32xbf16>
    %c0_34 = arith.constant 0 : index
    %c256 = arith.constant 256 : index
    %63 = vector.load %arg14[%c0_34, %c256] : memref<64x288xbf16, #tpu.memory_space<vmem>>, vector<64x32xbf16>
    tpu.vector_store %arg14[%c0_34, %c256], %62 {strides = array<i32>} : memref<64x288xbf16, #tpu.memory_space<vmem>>, vector<64x32xbf16>,
    %c0_35 = arith.constant 0 : index
    %c0_36 = arith.constant 0 : index
    %64 = vector.load %arg14[%c0_35, %c0_36] : memref<64x288xbf16, #tpu.memory_space<vmem>>, vector<64x288xbf16>
    %65 = arith.index_cast %arg1 : i32 to index
    %c0_37 = arith.constant 0 : index
    %c0_38 = arith.constant 0 : index
    %66 = vector.load %arg3[%65, %c0_37, %c0_38] : memref<2x288x96xbf16, #tpu.memory_space<vmem>>, vector<1x288x96xbf16>
    %67 = vector.shape_cast %66 : vector<1x288x96xbf16> to vector<288x96xbf16>
    %cst_39 = arith.constant dense<0.000000e+00> : vector<64x96xf32>
    %68 = tpu.matmul %64, %67, %cst_39 {dimension_numbers = #tpu.dot_dimension_numbers<[1], [0], [0], [1], [0, 0, 1, 1], [], []>} : vector<64x288xbf16>, vector<288x96xbf16>, vector<64x96xf32> -> vector<64x96xf32>
    %69 = arith.index_cast %arg1 : i32 to index
    %c0_40 = arith.constant 0 : index
    %c0_41 = arith.constant 0 : index
    %70 = vector.load %arg4[%69, %c0_40, %c0_41] : memref<2x1x96xf32, #tpu.memory_space<vmem>>, vector<1x1x96xf32>
    %71 = vector.shape_cast %70 : vector<1x1x96xf32> to vector<1x96xf32>
    %72 = vector.broadcast %71 : vector<1x96xf32> to vector<64x96xf32>
    %73 = arith.addf %68, %72 : vector<64x96xf32>
    %cst_42 = arith.constant 0.000000e+00 : f32
    %74 = vector.broadcast %cst_42 : f32 to vector<64x96xf32>
    %75 = arith.cmpf ogt, %73, %74 : vector<64x96xf32>
    %cst_43 = arith.constant 0.000000e+00 : f32
    %76 = vector.broadcast %cst_43 : f32 to vector<64x96xf32>
    %77 = arith.minimumf %73, %76 : vector<64x96xf32>
    %78 = math.exp %77 : vector<64x96xf32>
    %cst_44 = arith.constant 1.000000e+00 : f32
    %79 = vector.broadcast %cst_44 : f32 to vector<64x96xf32>
    %80 = arith.subf %78, %79 : vector<64x96xf32>
    %81 = arith.select %75, %73, %80 : vector<64x96xi1>, vector<64x96xf32>
    %82 = arith.index_cast %arg1 : i32 to index
    %c0_45 = arith.constant 0 : index
    %c0_46 = arith.constant 0 : index
    %83 = vector.load %arg5[%82, %c0_45, %c0_46] : memref<2x1x96xf32, #tpu.memory_space<vmem>>, vector<1x1x96xf32>
    %84 = vector.shape_cast %83 : vector<1x1x96xf32> to vector<1x96xf32>
    %85 = vector.broadcast %84 : vector<1x96xf32> to vector<64x96xf32>
    %86 = arith.mulf %81, %85 : vector<64x96xf32>
    %cst_47 = arith.constant dense<0.000000e+00> : vector<96xf32>
    %87 = vector.multi_reduction <add>, %86, %cst_47 [0] : vector<64x96xf32> to vector<96xf32>
    %88 = vector.shape_cast %87 : vector<96xf32> to vector<1x96xf32>
    %cst_48 = arith.constant 6.400000e+01 : f32
    %89 = vector.broadcast %cst_48 : f32 to vector<1x96xf32>
    %90 = arith.divf %88, %89 : vector<1x96xf32>
    %91 = arith.index_cast %arg1 : i32 to index
    %c0_49 = arith.constant 0 : index
    %c0_50 = arith.constant 0 : index
    %92 = vector.load %arg6[%91, %c0_49, %c0_50] : memref<2x6x96xf32, #tpu.memory_space<vmem>>, vector<1x6x96xf32>
    %93 = vector.shape_cast %92 : vector<1x6x96xf32> to vector<6x96xf32>
    %94 = vector.broadcast %90 : vector<1x96xf32> to vector<6x96xf32>
    %95 = arith.mulf %93, %94 : vector<6x96xf32>
    %cst_51 = arith.constant dense<0.000000e+00> : vector<6xf32>
    %96 = vector.multi_reduction <add>, %95, %cst_51 [1] : vector<6x96xf32> to vector<6xf32>
    %97 = vector.shape_cast %96 : vector<6xf32> to vector<6x1xf32>
    %98 = arith.index_cast %arg1 : i32 to index
    %c0_52 = arith.constant 0 : index
    %c0_53 = arith.constant 0 : index
    %99 = vector.load %arg7[%98, %c0_52, %c0_53] : memref<2x6x1xf32, #tpu.memory_space<vmem>>, vector<1x6x1xf32>
    %100 = vector.shape_cast %99 : vector<1x6x1xf32> to vector<6x1xf32>
    %101 = arith.addf %97, %100 : vector<6x1xf32>
    %cst_54 = arith.constant 0.000000e+00 : f32
    %102 = vector.broadcast %cst_54 : f32 to vector<6x1xf32>
    %103 = arith.maximumf %101, %102 : vector<6x1xf32>
    %104 = arith.index_cast %arg1 : i32 to index
    %c0_55 = arith.constant 0 : index
    %c0_56 = arith.constant 0 : index
    %105 = vector.load %arg8[%104, %c0_55, %c0_56] : memref<2x6x96xf32, #tpu.memory_space<vmem>>, vector<1x6x96xf32>
    %106 = vector.shape_cast %105 : vector<1x6x96xf32> to vector<6x96xf32>
    %107 = vector.broadcast %103 : vector<6x1xf32> to vector<6x96xf32>
    %108 = arith.mulf %106, %107 : vector<6x96xf32>
    %cst_57 = arith.constant dense<0.000000e+00> : vector<96xf32>
    %109 = vector.multi_reduction <add>, %108, %cst_57 [0] : vector<6x96xf32> to vector<96xf32>
    %110 = vector.shape_cast %109 : vector<96xf32> to vector<1x96xf32>
    %111 = arith.index_cast %arg1 : i32 to index
    %c0_58 = arith.constant 0 : index
    %c0_59 = arith.constant 0 : index
    %112 = vector.load %arg9[%111, %c0_58, %c0_59] : memref<2x1x96xf32, #tpu.memory_space<vmem>>, vector<1x1x96xf32>
    %113 = vector.shape_cast %112 : vector<1x1x96xf32> to vector<1x96xf32>
    %114 = arith.addf %110, %113 : vector<1x96xf32>
    %cst_60 = arith.constant 0.000000e+00 : f32
    %115 = vector.broadcast %cst_60 : f32 to vector<1x96xf32>
    %116 = arith.subf %115, %114 : vector<1x96xf32>
    %117 = math.exp %116 : vector<1x96xf32>
    %cst_61 = arith.constant 1.000000e+00 : f32
    %118 = vector.broadcast %cst_61 : f32 to vector<1x96xf32>
    %119 = arith.addf %118, %117 : vector<1x96xf32>
    %cst_62 = arith.constant 1.000000e+00 : f32
    %120 = vector.broadcast %cst_62 : f32 to vector<1x96xf32>
    %121 = arith.divf %120, %119 : vector<1x96xf32>
    %122 = vector.broadcast %121 : vector<1x96xf32> to vector<64x96xf32>
    %123 = arith.mulf %86, %122 : vector<64x96xf32>
    %124 = arith.truncf %123 : vector<64x96xf32> to vector<64x96xbf16>
    %125 = arith.index_cast %arg1 : i32 to index
    %c0_63 = arith.constant 0 : index
    %c0_64 = arith.constant 0 : index
    %126 = vector.load %arg10[%125, %c0_63, %c0_64] : memref<2x96x32xbf16, #tpu.memory_space<vmem>>, vector<1x96x32xbf16>
    %127 = vector.shape_cast %126 : vector<1x96x32xbf16> to vector<96x32xbf16>
    %cst_65 = arith.constant dense<0.000000e+00> : vector<64x32xf32>
    %128 = tpu.matmul %124, %127, %cst_65 {dimension_numbers = #tpu.dot_dimension_numbers<[1], [0], [0], [1], [0, 0, 1, 1], [], []>} : vector<64x96xbf16>, vector<96x32xbf16>, vector<64x32xf32> -> vector<64x32xf32>
    %129 = arith.index_cast %arg1 : i32 to index
    %c0_66 = arith.constant 0 : index
    %c0_67 = arith.constant 0 : index
    %130 = vector.load %arg11[%129, %c0_66, %c0_67] : memref<2x1x32xf32, #tpu.memory_space<vmem>>, vector<1x1x32xf32>
    %131 = vector.shape_cast %130 : vector<1x1x32xf32> to vector<1x32xf32>
    %132 = vector.broadcast %131 : vector<1x32xf32> to vector<64x32xf32>
    %133 = arith.addf %128, %132 : vector<64x32xf32>
    %134 = arith.addf %133, %4 : vector<64x32xf32>
    %c0_68 = arith.constant 0 : index
    %c0_69 = arith.constant 0 : index
    %c0_70 = arith.constant 0 : index
    %135 = vector.load %arg12[%c0_68, %c0_69, %c0_70] : memref<1x64x32xf32, #tpu.memory_space<vmem>>, vector<1x64x32xf32>
    %136 = vector.shape_cast %135 : vector<1x64x32xf32> to vector<64x32xf32>
    %137 = vector.shape_cast %134 : vector<64x32xf32> to vector<1x64x32xf32>
    tpu.vector_store %arg12[%c0_68, %c0_69, %c0_70], %137 {strides = array<i32>} : memref<1x64x32xf32, #tpu.memory_space<vmem>>, vector<1x64x32xf32>,
    return
  }
  func.func @transform_0(%arg0: i32, %arg1: i32) -> (i32, i32, i32) {
    %c0_i32 = arith.constant 0 : i32
    %c0_i32_0 = arith.constant 0 : i32
    %c0_i32_1 = arith.constant 0 : i32
    return %arg0, %c0_i32, %c0_i32_0 : i32, i32, i32
  }
  func.func @transform_1(%arg0: i32, %arg1: i32) -> (i32, i32, i32) {
    %c0_i32 = arith.constant 0 : i32
    %c0_i32_0 = arith.constant 0 : i32
    %c0_i32_1 = arith.constant 0 : i32
    %c0_i32_2 = arith.constant 0 : i32
    return %c0_i32, %c0_i32_0, %c0_i32_1 : i32, i32, i32
  }
  func.func @transform_2(%arg0: i32, %arg1: i32) -> (i32, i32, i32) {
    %c0_i32 = arith.constant 0 : i32
    %c0_i32_0 = arith.constant 0 : i32
    %c0_i32_1 = arith.constant 0 : i32
    %c0_i32_2 = arith.constant 0 : i32
    return %c0_i32, %c0_i32_0, %c0_i32_1 : i32, i32, i32
  }
  func.func @transform_3(%arg0: i32, %arg1: i32) -> (i32, i32, i32) {
    %c0_i32 = arith.constant 0 : i32
    %c0_i32_0 = arith.constant 0 : i32
    %c0_i32_1 = arith.constant 0 : i32
    %c0_i32_2 = arith.constant 0 : i32
    return %c0_i32, %c0_i32_0, %c0_i32_1 : i32, i32, i32
  }
  func.func @transform_4(%arg0: i32, %arg1: i32) -> (i32, i32, i32) {
    %c0_i32 = arith.constant 0 : i32
    %c0_i32_0 = arith.constant 0 : i32
    %c0_i32_1 = arith.constant 0 : i32
    %c0_i32_2 = arith.constant 0 : i32
    return %c0_i32, %c0_i32_0, %c0_i32_1 : i32, i32, i32
  }
  func.func @transform_5(%arg0: i32, %arg1: i32) -> (i32, i32, i32) {
    %c0_i32 = arith.constant 0 : i32
    %c0_i32_0 = arith.constant 0 : i32
    %c0_i32_1 = arith.constant 0 : i32
    %c0_i32_2 = arith.constant 0 : i32
    return %c0_i32, %c0_i32_0, %c0_i32_1 : i32, i32, i32
  }
  func.func @transform_6(%arg0: i32, %arg1: i32) -> (i32, i32, i32) {
    %c0_i32 = arith.constant 0 : i32
    %c0_i32_0 = arith.constant 0 : i32
    %c0_i32_1 = arith.constant 0 : i32
    %c0_i32_2 = arith.constant 0 : i32
    return %c0_i32, %c0_i32_0, %c0_i32_1 : i32, i32, i32
  }
  func.func @transform_7(%arg0: i32, %arg1: i32) -> (i32, i32, i32) {
    %c0_i32 = arith.constant 0 : i32
    %c0_i32_0 = arith.constant 0 : i32
    %c0_i32_1 = arith.constant 0 : i32
    %c0_i32_2 = arith.constant 0 : i32
    return %c0_i32, %c0_i32_0, %c0_i32_1 : i32, i32, i32
  }
  func.func @transform_8(%arg0: i32, %arg1: i32) -> (i32, i32, i32) {
    %c0_i32 = arith.constant 0 : i32
    %c0_i32_0 = arith.constant 0 : i32
    %c0_i32_1 = arith.constant 0 : i32
    %c0_i32_2 = arith.constant 0 : i32
    return %c0_i32, %c0_i32_0, %c0_i32_1 : i32, i32, i32
  }
  func.func @transform_9(%arg0: i32, %arg1: i32) -> (i32, i32, i32) {
    %c0_i32 = arith.constant 0 : i32
    %c0_i32_0 = arith.constant 0 : i32
    %c0_i32_1 = arith.constant 0 : i32
    %c0_i32_2 = arith.constant 0 : i32
    return %c0_i32, %c0_i32_0, %c0_i32_1 : i32, i32, i32
  }
  func.func @transform_10(%arg0: i32, %arg1: i32) -> (i32, i32, i32) {
    %c0_i32 = arith.constant 0 : i32
    %c0_i32_0 = arith.constant 0 : i32
    %c0_i32_1 = arith.constant 0 : i32
    return %arg0, %c0_i32, %c0_i32_0 : i32, i32, i32
  }
}

</mosaic_0001>

<bundles_post_ra>
// kernel: tpu_custom_call.1
= control target key start
LH: loop header
LB: loop body
LE: loop exit
PB: predicated region body
PF: predicated region fallthrough
CT: control target
= control target key end

     0   :  { %s2218_s13 = smov 0   ;;  %s2220_s14 = smov 0   ;;  %s2949_s0 = inlined_call_operand.vmem [shape: f32[2,64,32], index: 0, kind: input, shape index: {}]   ;;  %s2950_s1 = inlined_call_operand.vmem [shape: bf16[2,288,96], index: 1, kind: input, shape index: {}]   ;;  %s2951_s2 = inlined_call_operand.vmem [shape: f32[2,1,96], index: 2, kind: input, shape index: {}]   ;;  %s2952_s3 = inlined_call_operand.vmem [shape: f32[2,1,96], index: 3, kind: input, shape index: {}]   ;;  %s2953_s4 = inlined_call_operand.vmem [shape: f32[2,6,96], index: 4, kind: input, shape index: {}]   ;;  %s2954_s5 = inlined_call_operand.vmem [shape: f32[2,6,1], index: 5, kind: input, shape index: {}]   ;;  %s2955_s6 = inlined_call_operand.vmem [shape: f32[2,6,96], index: 6, kind: input, shape index: {}]   ;;  %s2956_s7 = inlined_call_operand.vmem [shape: f32[2,1,96], index: 7, kind: input, shape index: {}]   ;;  %s2957_s8 = inlined_call_operand.vmem [shape: bf16[2,96,32], index: 8, kind: input, shape index: {}]   ;;  %s2958_s9 = inlined_call_operand.vmem [shape: f32[2,1,32], index: 9, kind: input, shape index: {}]   ;;  %s2959_s10 = inlined_call_operand.vmem [shape: f32[2,64,32], index: 10, kind: output, shape index: {}]  }
   0x1   :  { %s2222_s15 = smov 0   ;;  %s2224_s16 = smov 0  }
   0x2   :  { %s2226_s17 = smov 0  }
   0x3 LB: > { %s29_s18 = sadd.s32 1, %s2148_s15  ;;  %s32_s19 = sadd.s32 1, %s2152_s16  ;;  %s2156_s17 = sphi %s2226_s17, %s20_s17   ;;  %s2152_s16 = sphi %s2224_s16, %s2983_s16   ;;  %s2148_s15 = sphi %s2222_s15, %s2982_s15   ;;  %s2144_s14 = sphi %s2220_s14, %s2981_s14   ;;  %s2140_s13 = sphi %s2218_s13, %s2980_s13  }
   0x4   : > { %p30_p0 = scmp.ge.s32.totalorder %s29_s18, 2  ;;  %p1865_p1 = scmp.ge.s32.totalorder %s2156_s17, 1 }
   0x5   : > { %p324_p2 = scmp.lt.s32.totalorder %s2156_s17, 5 }
   0x6   : > { %s2985_s18 = smov (%p30_p0, %s29_s18), 0  ;;  %s2987_s19 = smov (!%p30_p0, %s32_s19), %s2152_s16 }
   0x7   : > { %p325_p3 = pnand %p1865_p1, %p324_p2  ;;  %p34_p4 = scmp.ge.s32.totalorder %s2987_s19, 2 }
   0x8   : > { %p362_p5 = scmp.lt.s32.totalorder (!%p325_p3), %s2144_s14, 1  ;;  %p1870_p6 = scmp.ne.s32.totalorder (!%p325_p3), %s2140_s13, 0 }
   0x9   : > { %s2989_s19 = smov (%p34_p4, %s2987_s19), 0  ;;  %328 = sbr.rel (%p325_p3) target bundleno = 1058 (0x422), region = 60 }
  0x10   : > { %s2991_s14 = smov (!%p362_p5, %s2144_s14), 1  ;;  %378 = sbr.rel (%p1870_p6) target bundleno = 24 (0x18), region = 64 }
  0x11   : > { %s1927_s20 = sshll.u32 %s2991_s14, 6  ;;  %vm387_vm0 = vcmask (!%p1870_p6), 261120   ;;  %v2158_v6 = vmov (!%p1870_p6), 0  }
  0x12   : > { %s366_s23 = scalar_lea.vmem %s2949_s0, %s1927_s20  ;;  %s2256_s26 = scalar_lea.vmem %s2959_s10, %s1927_s20  ;;  %397 = vst.msk [vmem:[#allocation2 + $0x8] sm:$0xff] (!%p1870_p6), %vm387_vm0, %v2158_v6  ;;  %398 = vst.msk [vmem:[#allocation2 + $0x30] sm:$0xff] (!%p1870_p6), %vm387_vm0, %v2158_v6 }
  0x13   : > { %v379_v0 = vld [vmem:[%s366_s23] sm:$0xff] (!%p1870_p6)  ;;  %v380_v1 = vld [vmem:[%s366_s23 + $0x8] sm:$0xff] (!%p1870_p6)  ;;  %v381_v2 = vld [vmem:[%s366_s23 + $0x10] sm:$0xff] (!%p1870_p6) }
  0x14   : > { %388 = vst.msk [vmem:[%s2256_s26] sm:$0xff] (!%p1870_p6), %vm387_vm0, %v379_v0  ;;  %389 = vst.msk [vmem:[%s2256_s26 + $0x8] sm:$0xff] (!%p1870_p6), %vm387_vm0, %v380_v1  ;;  %v382_v3 = vld [vmem:[%s366_s23 + $0x18] sm:$0xff] (!%p1870_p6)  ;;  %v383_v4 = vld [vmem:[%s366_s23 + $0x20] sm:$0xff] (!%p1870_p6) }
  0x15   : > { %390 = vst.msk [vmem:[%s2256_s26 + $0x10] sm:$0xff] (!%p1870_p6), %vm387_vm0, %v381_v2  ;;  %v384_v5 = vld [vmem:[%s366_s23 + $0x28] sm:$0xff] (!%p1870_p6)  ;;  %391 = vst.msk [vmem:[%s2256_s26 + $0x18] sm:$0xff] (!%p1870_p6), %vm387_vm0, %v382_v3  ;;  %v385_v7 = vld [vmem:[%s366_s23 + $0x30] sm:$0xff] (!%p1870_p6) }
  0x16   : > { %392 = vst.msk [vmem:[%s2256_s26 + $0x20] sm:$0xff] (!%p1870_p6), %vm387_vm0, %v383_v4  ;;  %393 = vst.msk [vmem:[%s2256_s26 + $0x28] sm:$0xff] (!%p1870_p6), %vm387_vm0, %v384_v5  ;;  %v386_v8 = vld [vmem:[%s366_s23 + $0x38] sm:$0xff] (!%p1870_p6) }
  0x17   : > { %394 = vst.msk [vmem:[%s2256_s26 + $0x30] sm:$0xff] %vm387_vm0, %v385_v7  ;;  %395 = vst.msk [vmem:[%s2256_s26 + $0x38] sm:$0xff] %vm387_vm0, %v386_v8 }
  0x18 PF: > { %vm412_vm1 = vcmask 261120   ;;  %v417_v11 = vlaneseq  ;;  %v2159_v20 = vmov 0   ;;  %s1929_s27 = smul.u32 144, %s2140_s13  ;;  %vm680_vm9 = vcmask 1043456   ;;  %s2160_s11 = smov 32  }
  0x19   : > { %2064 = vset.pattern.permute.xlu1 %v2159_v20  ;;  %2065 = vset.pattern.permute.xlu0 %v2159_v20  ;;  %vm873_vm14 = vsmask.f32 256  ;;  %s2161_s12 = smov 96   ;;  %s2162_s14 = smov 64  }
  0x1a   : > { %v2283_v18 = vshrl.u32 %v417_v11, 7  ;;  %v670_v25 = vld [vmem:[#allocation2 + $0x8] sm:$0xf0]  ;;  %s2353_s30 = scalar_lea.vmem %s2950_s1, %s1929_s27  ;;  %s1231_s22 = scalar_lea.vmem %s2951_s2, %s2140_s13 }
  0x1b   : > { %v681_v40 = vrot.slane %v670_v25, 4  ;;  %v2066_v2 = vld [vmem:[%s2353_s30 + $0x40] sm:$0xff]   ;;  %v2070_v41 = vld [vmem:[%s2353_s30 + $0x50] sm:$0xff]   ;;  %v2072_v56 = vld [vmem:[%s2353_s30 + $0x58] sm:$0xff]   ;;  %s1537_s25 = scalar_lea.vmem %s2952_s3, %s2140_s13  ;;  %s2869_s27 = sshll.u32 %s2140_s13, 3 }
  0x1c   : > { %v400_v9 = vld [vmem:[%s2256_s26] sm:$0xff]  ;;  %v401_v10 = vld [vmem:[%s2256_s26 + $0x8] sm:$0xff]  ;;  %v419_v21 = vadd.s32 8, %v2283_v18  ;;  %v420_v22 = vadd.s32 16, %v2283_v18  ;;  %v421_v23 = vadd.s32 24, %v2283_v18  ;;  %v430_v24 = vand.u32 7, %v2283_v18  ;;  %1931 = vmatprep.subr.bf16.mxu0 %v2066_v2  ;;  %s1589_s28 = scalar_lea.vmem %s2955_s6, %s2869_s27 }
  0x1d   : > { %v408_v12 = vpack.c.bf16 %v401_v10, %v400_v9  ;;  %v402_v13 = vld [vmem:[%s2256_s26 + $0x10] sm:$0xff]  ;;  %v403_v14 = vld [vmem:[%s2256_s26 + $0x18] sm:$0xff]  ;;  %v2295_v26 = vadd.s32 32, %v2283_v18  ;;  %v2298_v27 = vadd.s32 40, %v2283_v18  ;;  %v2067_v7 = vld [vmem:[%s2353_s30] sm:$0xff]   ;;  %s1930_s20 = smul.u32 48, %s2140_s13 }
  0x1e   : > { %v404_v15 = vld [vmem:[%s2256_s26 + $0x20] sm:$0xff]  ;;  %v409_v16 = vpack.c.bf16 %v403_v14, %v402_v13  ;;  %v405_v17 = vld [vmem:[%s2256_s26 + $0x28] sm:$0xff]  ;;  %v437_v28 = vand.u32 7, %v419_v21  ;;  %v444_v29 = vand.u32 7, %v420_v22  ;;  %v451_v30 = vand.u32 7, %v421_v23  ;;  %v406_v31 = vld [vmem:[%s2256_s26 + $0x30] sm:$0xff]  ;;  %1932 = vmatpush3.bf16.msra.mxu0 %v2067_v7 }
  0x1f   : > { %413 = vst.msk [vmem:[#allocation2 + $0x10] sm:$0xff] %vm412_vm1, %v408_v12  ;;  %v410_v19 = vpack.c.bf16 %v405_v17, %v404_v15  ;;  %vm522_vm2 = vcmp.ne.s32.totalorder %v430_v24, 7  ;;  %v407_v32 = vld [vmem:[%s2256_s26 + $0x38] sm:$0xff]  ;;  %vm2302_vm4 = vcmp.ne.s32.totalorder %v430_v24, 0  ;;  %v458_v34 = vand.u32 7, %v2295_v26  ;;  %v2068_v23 = vld [vmem:[%s2353_s30 + $0x48] sm:$0xff]   ;;  %s1631_s23 = scalar_lea.vmem %s2957_s8, %s1930_s20 }
  0x20   : > { %414 = vst.msk [vmem:[#allocation2 + $0x18] sm:$0xff] %vm412_vm1, %v409_v16  ;;  %vm712_vm3 = vmpackc.low %vm522_vm2, %vm522_vm2  ;;  %v465_v35 = vand.u32 7, %v2298_v27  ;;  %v411_v36 = vpack.c.bf16 %v407_v32, %v406_v31  ;;  %vm523_vm5 = vcmp.ne.s32.totalorder %v437_v28, 7  ;;  %vm2309_vm6 = vcmp.ne.s32.totalorder %v444_v29, 7  ;;  %1933 = vmatprep.subr.bf16.mxu0 %v2068_v23  ;;  %v2071_v46 = vld [vmem:[%s2353_s30 + $0x10] sm:$0xff]   ;;  %v2074_v23 = vld [vmem:[%s2353_s30 + $0x60] sm:$0xff]  }
  0x21   : > { %415 = vst.msk [vmem:[#allocation2 + $0x20] sm:$0xff] %vm412_vm1, %v410_v19  ;;  %vm2313_vm7 = vcmp.ne.s32.totalorder %v451_v30, 7  ;;  %v720_v39 = vsel %vm712_vm3, 65537, %v2159_v20  ;;  %vm543_vm8 = vmpackc.low %vm2302_vm4, %vm2302_vm4  ;;  %vm2321_vm11 = vcmp.ne.s32.totalorder %v437_v28, 0  ;;  %vm2325_vm12 = vcmp.ne.s32.totalorder %v444_v29, 0  ;;  %v2069_v29 = vld [vmem:[%s2353_s30 + $0x8] sm:$0xff]  }
  0x22   : > { %vm713_vm10 = vmpackc.low %vm523_vm5, %vm523_vm5  ;;  %416 = vst.msk [vmem:[#allocation2 + $0x28] sm:$0xff] %vm412_vm1, %v411_v36  ;;  %vm2336_vm15 = vcmp.ne.s32.totalorder %v451_v30, 0  ;;  %v551_v47 = vsel %vm543_vm8, 65537, %v2159_v20  ;;  %vm2366_vm3 = vcmp.ne.s32.totalorder %v458_v34, 7  ;;  %vm2372_vm4 = vcmp.ne.s32.totalorder %v465_v35, 7  ;;  %1934 = vmatpush3.bf16.msra.mxu0 %v2069_v29  ;;  %v2077_v27 = vld [vmem:[%s2353_s30 + $0x28] sm:$0xff]  }
  0x23   : > { %vm714_vm13 = vmpackc.low %vm2309_vm6, %vm2309_vm6  ;;  %v721_v45 = vsel %vm713_vm10, 65537, %v2159_v20  ;;  %1935 = vmatprep.subr.bf16.mxu0 %v2070_v41 }
  0x24   : > { %vm715_vm0 = vmpackc.low %vm2313_vm7, %vm2313_vm7  ;;  %v722_v51 = vsel %vm714_vm13, 65537, %v2159_v20  ;;  %v2348_v52 = vcombine.low %v720_v39, %v721_v45  ;;  %vm571_vm7 = vsmask.f32 3328 }
  0x25   : > { %v723_v55 = vsel %vm715_vm0, 65537, %v2159_v20  ;;  %vm544_vm2 = vmpackc.low %vm2321_vm11, %vm2321_vm11  ;;  %vm851_vm11 = vsmask.f32 7424 }
  0x26   : > { %v2330_v43 = vld [vmem:[#allocation2 + $0x10] sm:$0xff]  ;;  %v2382_v60 = vcombine.low %v722_v51, %v723_v55  ;;  %v741_v61 = vshrl.u32 %v2348_v52, 16  ;;  %vm545_vm5 = vmpackc.low %vm2325_vm12, %vm2325_vm12  ;;  %v744_v0 = vshll.u32 %v2348_v52, 16  ;;  %v552_v1 = vsel %vm544_vm2, 65537, %v2159_v20  ;;  %1936 = vmatpush3.bf16.msra.mxu0 %v2071_v46 }
  0x27   : > { %v1083_v44 = vld [vmem:[#allocation2 + $0x10] sm:$0xf0]  ;;  %v682_v48 = vrot.slane %v2330_v43, 4  ;;  %v2342_v49 = vld [vmem:[#allocation2 + $0x18] sm:$0xff]  ;;  %931 = vst.msk [vmem:[#allocation3 + $0x8] sm:$0xff] %vm412_vm1, %v2330_v43  ;;  %vm546_vm6 = vmpackc.low %vm2336_vm15, %vm2336_vm15  ;;  %v553_v8 = vsel %vm545_vm5, 65537, %v2159_v20  ;;  %v2418_v10 = vcombine.low %v551_v47, %v552_v1  ;;  %1937 = vmatprep.subr.bf16.mxu0 %v2072_v56 }
  0x28   : > { %v1093_v50 = vrot.slane %v1083_v44, 4  ;;  %v1094_v53 = vrot.slane %v2342_v49, 4  ;;  %v2358_v54 = vld [vmem:[#allocation2 + $0x20] sm:$0xff]  ;;  %932 = vst.msk [vmem:[#allocation3 + $0x20] sm:$0xff] %vm412_vm1, %v2342_v49  ;;  %v749_v4 = vshrl.u32 %v2382_v60, 16  ;;  %v752_v5 = vshll.u32 %v2382_v60, 16  ;;  %vm716_vm8 = vmpackc.low %vm2366_vm3, %vm2366_vm3 }
  0x29   : > { %v683_v58 = vsel %vm680_vm9, %v681_v40, %v682_v48  ;;  %v2380_v59 = vrot.slane %v2358_v54, 4  ;;  %v940_v6 = vrot.slane %v741_v61, 7  ;;  %v554_v9 = vsel %vm546_vm6, 65537, %v2159_v20  ;;  %vm717_vm10 = vmpackc.low %vm2372_vm4, %vm2372_vm4  ;;  %v2424_v12 = vld [vmem:[#allocation2 + $0x28] sm:$0xff]  ;;  %v1013_v33 = vld [vmem:[#allocation2 + $0x10] sm:$0xf8] }
  0x2a   : > { %690 = vrot.lane.b32.xlu0 %v683_v58, %s2160_s11  ;;  %v1095_v62 = vsel %vm680_vm9, %v1093_v50, %v1094_v53  ;;  %v685_v63 = vsel %vm680_vm9, %v682_v48, %v1094_v53  ;;  %v724_v11 = vsel %vm716_vm8, 65537, %v2159_v20  ;;  %v942_v14 = vrot.slane %v749_v4, 7  ;;  %934 = vst.msk [vmem:[#allocation3 + $0x50] sm:$0xff] %vm412_vm1, %v2424_v12  ;;  %v2073_v1 = vld [vmem:[%s2353_s30 + $0x18] sm:$0xff]  }
  0x2b   : > { %692 = vrot.lane.b32.xlu1 %v685_v63, %s2160_s11  ;;  %v1097_v3 = vsel %vm680_vm9, %v1094_v53, %v2380_v59  ;;  %v941_v13 = vor.u32 %v940_v6, %v744_v0  ;;  %v2428_v15 = vcombine.low %v553_v8, %v554_v9  ;;  %v725_v16 = vsel %vm717_vm10, 65537, %v2159_v20  ;;  %v1118_v8 = vld [vmem:[#allocation2 + $0x10] sm:$0xf0]  ;;  %1938 = vmatpush3.bf16.msra.mxu0 %v2073_v1 }
  0x2c   : > { %v573_v17 = vshrl.u32 %v2418_v10, 16  ;;  %v576_v19 = vshll.u32 %v2418_v10, 16  ;;  %v2436_v21 = vcombine.low %v724_v11, %v725_v16  ;;  %v743_v22 = vrot.slane %v741_v61, 3  ;;  %1939 = vmatprep.subr.bf16.mxu0 %v2074_v23 }
  0x2d   : > { %v943_v24 = vor.u32 %v942_v14, %v752_v5  ;;  %vm951_vm12 = vcmp.ne.s16.totalorder %v941_v13, 0  ;;  %v581_v25 = vshrl.u32 %v2428_v15, 16  ;;  %v584_v28 = vshll.u32 %v2428_v15, 16 }
  0x2e   : > { %1102 = vrot.lane.b32.xlu0 %v1095_v62, %s2161_s12  ;;  %v956_v30 = vsel %vm951_vm12, %v2330_v43, 0  ;;  %v575_v31 = vrot.slane %v573_v17, 4  ;;  %v578_v32 = vrot.slane %v576_v19, 5  ;;  %v758_v36 = vshrl.u32 %v2436_v21, 16 }
  0x2f   : > { %694 = vrot.lane.b32.xlu1 %v1097_v3, %s2160_s11  ;;  %v944_v37 = vsel %vm873_vm14, %v940_v6, %v943_v24  ;;  %v962_v38 = vshrl.u32 %v956_v30, 16  ;;  %v964_v39 = vshll.u32 %v956_v30, 16  ;;  %v583_v40 = vrot.slane %v581_v25, 4 }
  0x30   : > { %vm952_vm13 = vcmp.ne.s16.totalorder %v944_v37, 0  ;;  %v2456_v42 = vor.u32 %v578_v32, %v575_v31  ;;  %v586_v44 = vrot.slane %v584_v28, 5  ;;  %v761_v45 = vshll.u32 %v2436_v21, 16 }
  0x31   : > { %v957_v47 = vsel %vm952_vm13, %v2342_v49, 0  ;;  %v966_v48 = vrot.slane %v964_v39, 1  ;;  %vm617_vm15 = vsmask.f32 4352  ;;  %v2465_v50 = vrot.slane %v758_v36, 7 }
  0x32   : > { %1104 = vrot.lane.b32.xlu0 %v1097_v3, %s2161_s12  ;;  %v746_v51 = vrot.slane %v744_v0, 4  ;;  %v969_v52 = vshll.u32 %v957_v47, 16  ;;  %v2467_v53 = vor.u32 %v586_v44, %v583_v40  ;;  %vm607_vm0 = vcmp.ne.s16.totalorder %v2456_v42, 0  ;;  %v707_v3 = vld [vmem:[#allocation2 + $0x8] sm:$0xf0] }
  0x33   : > { %vm2472_vm2 = vcmp.ne.s32.totalorder %v458_v34, 0  ;;  %v967_v57 = vor.u32 %v966_v48, %v962_v38  ;;  %v1018_v58 = vsel %vm607_vm0, %v1013_v33, 0  ;;  %v946_v61 = vor.u32 %v2465_v50, %v761_v45 }
  0x34   : > { %v973_v62 = vshrl.u32 %v957_v47, 16  ;;  %v971_v63 = vrot.slane %v969_v52, 1  ;;  %v2485_v26 = vsel %vm571_vm7, %v2456_v42, %v2467_v53  ;;  %v1024_v34 = vshrl.u32 %v1018_v58, 16  ;;  %vm547_vm6 = vmpackc.low %vm2472_vm2, %vm2472_vm2  ;;  %v2076_v47 = vld [vmem:[%s2353_s30 + $0x68] sm:$0xff]  }
  0x35   : > { %v1027_v0 = vshll.u32 %v1018_v58, 16  ;;  %vm608_vm3 = vcmp.ne.s16.totalorder %v2485_v26, 0  ;;  %v947_v2 = vsel %vm873_vm14, %v942_v14, %v946_v61  ;;  %v747_v6 = vor.u32 %v746_v51, %v743_v22 }
  0x36   : > { %v751_v7 = vrot.slane %v749_v4, 3  ;;  %v972_v9 = vsel %vm851_vm11, %v967_v57, %v971_v63  ;;  %v1019_v11 = vsel %vm608_vm3, %v2342_v49, 0  ;;  %v1026_v13 = vrot.slane %v1024_v34, 3 }
  0x37   : > { %v1029_v16 = vrot.slane %v1027_v0, 4  ;;  %997 = vrot.lane.b32.xlu0 %v972_v9, %s2160_s11  ;;  %v1032_v24 = vshrl.u32 %v1019_v11, 16  ;;  %v1035_v29 = vshll.u32 %v1019_v11, 16  ;;  %vm953_vm4 = vcmp.ne.s16.totalorder %v947_v2, 0 }
  0x38   : > { %v2499_v4 = vsel %vm953_vm4, %v2358_v54, 0  ;;  %v975_v22 = vor.u32 %v973_v62, %v971_v63  ;;  %v754_v30 = vrot.slane %v752_v5, 4  ;;  %vm775_vm5 = vcmp.ne.s16.totalorder %v747_v6, 0  ;;  %v2075_v5 = vld [vmem:[%s2353_s30 + $0x20] sm:$0xff]  }
  0x39   : > { %v1030_v14 = vor.u32 %v1029_v16, %v1026_v13  ;;  %v1034_v31 = vrot.slane %v1032_v24, 3  ;;  %v1037_v32 = vrot.slane %v1035_v29, 4  ;;  %v977_v33 = vshll.u32 %v2499_v4, 16  ;;  %1940 = vmatpush3.bf16.msra.mxu0 %v2075_v5  ;;  %v538_v5 = vld [vmem:[#allocation2 + $0x8] sm:$0xf8] }
  0x3a   : > { %v2507_v37 = vor.u32 %v754_v30, %v751_v7  ;;  %v780_v38 = vsel %vm775_vm5, %v707_v3, 0  ;;  %v1123_v39 = vsel %vm775_vm5, %v1118_v8, 0  ;;  %vm2511_vm8 = vcmp.ne.s32.totalorder %v465_v35, 0  ;;  %1941 = vmatprep.subr.bf16.mxu0 %v2076_v47  ;;  %v846_v8 = vld [vmem:[#allocation2 + $0x8] sm:$0x80] }
  0x3b   : > { %v2516_v40 = vor.u32 %v1037_v32, %v1034_v31  ;;  %v2518_v41 = vrot.slane %v977_v33, 1  ;;  %v786_v44 = vshrl.u32 %v780_v38, 16  ;;  %v789_v46 = vshll.u32 %v780_v38, 16  ;;  %vm548_vm12 = vmpackc.low %vm2511_vm8, %vm2511_vm8 }
  0x3c   : > { %v756_v48 = vsel %vm617_vm15, %v747_v6, %v2507_v37  ;;  %v1129_v51 = vshrl.u32 %v1123_v39, 16  ;;  %v1132_v52 = vshll.u32 %v1123_v39, 16  ;;  %v555_v55 = vsel %vm547_vm6, 65537, %v2159_v20 }
  0x3d   : > { %v1039_v35 = vsel %vm617_vm15, %v1030_v14, %v2516_v40  ;;  %v980_v56 = vsel %vm851_vm11, %v975_v22, %v2518_v41  ;;  %vm776_vm10 = vcmp.ne.s16.totalorder %v756_v48, 0  ;;  %v788_v57 = vrot.slane %v786_v44, 4  ;;  %1942 = vmatpush3.bf16.msra.mxu0 %v2077_v27  ;;  %v2078_v27 = vld [vmem:[%s2353_s30 + $0x70] sm:$0xff]  }
  0x3e   : > { %1067 = vrot.lane.b32.xlu1 %v1039_v35, %s2162_s14  ;;  %999 = vrot.lane.b32.xlu0 %v980_v56, %s2160_s11  ;;  %v781_v58 = vsel %vm776_vm10, %v2330_v43, 0  ;;  %v791_v61 = vrot.slane %v789_v46, 5  ;;  %v1124_v62 = vsel %vm776_vm10, %v2342_v49, 0  ;;  %v1131_v63 = vrot.slane %v1129_v51, 4  ;;  %v2079_v35 = vld [vmem:[%s2353_s30 + $0x30] sm:$0xff]   ;;  %v2080_v56 = vld [vmem:[%s2353_s30 + $0x78] sm:$0xff]  }
  0x3f   : > { %v794_v34 = vshrl.u32 %v781_v58, 16  ;;  %v797_v0 = vshll.u32 %v781_v58, 16  ;;  %v1134_v1 = vrot.slane %v1132_v52, 5  ;;  %v1137_v2 = vshrl.u32 %v1124_v62, 16  ;;  %1943 = vmatprep.subr.bf16.mxu0 %v2078_v27 }
  0x40   : > { %v792_v3 = vor.u32 %v791_v61, %v788_v57  ;;  %v1140_v6 = vshll.u32 %v1124_v62, 16  ;;  %v556_v7 = vsel %vm548_vm12, 65537, %v2159_v20  ;;  %v852_v9 = vrot.slane %v576_v19, 1 }
  0x41   : > { %v796_v11 = vrot.slane %v794_v34, 4  ;;  %v799_v13 = vrot.slane %v797_v0, 5  ;;  %v1135_v16 = vor.u32 %v1134_v1, %v1131_v63  ;;  %v1139_v23 = vrot.slane %v1137_v2, 4  ;;  %v2081_v63 = vld [vmem:[%s2353_s30 + $0x80] sm:$0xff]   ;;  %1944 = vmatpush3.bf16.msra.mxu0 %v2079_v35  ;;  %v2083_v35 = vld [vmem:[%s2353_s30 + $0x88] sm:$0xff]  }
  0x42   : > { %v1142_v24 = vrot.slane %v1140_v6, 5  ;;  %v2539_v29 = vcombine.low %v555_v55, %v556_v7  ;;  %v853_v14 = vor.u32 %v852_v9, %v573_v17  ;;  %v2545_v22 = vrot.slane %v584_v28, 1  ;;  %v929_v2 = vld [vmem:[#allocation2 + $0x20] sm:$0xff]  ;;  %1987 = vmatprep.subr.bf16.mxu1 %v2081_v63  ;;  %1945 = vmatprep.subr.bf16.mxu0 %v2080_v56 }
  0x43   : > { %v2547_v30 = vor.u32 %v799_v13, %v796_v11  ;;  %vm863_vm13 = vcmp.ne.s16.totalorder %v852_v9, 0  ;;  %v760_v19 = vrot.slane %v758_v36, 3  ;;  %v763_v31 = vrot.slane %v761_v45, 4  ;;  %933 = vst.msk [vmem:[#allocation3 + $0x38] sm:$0xff] %vm412_vm1, %v929_v2  ;;  %1988 = vmatpush3.bf16.msra.mxu1 %v2081_v63 }
  0x44   : > { %v2553_v32 = vor.u32 %v1142_v24, %v1139_v23  ;;  %v590_v33 = vshrl.u32 %v2539_v29, 16  ;;  %v593_v10 = vshll.u32 %v2539_v29, 16  ;;  %v855_v17 = vsel %vm851_vm11, %v853_v14, %v2545_v22  ;;  %1989 = vmatprep.subr.bf16.mxu1 %v2083_v35 }
  0x45   : > { %v801_v28 = vsel %vm571_vm7, %v792_v3, %v2547_v30  ;;  %vm864_vm2 = vcmp.ne.s16.totalorder %v855_v17, 0  ;;  %v868_v38 = vsel %vm863_vm13, %v846_v8, 0  ;;  %v2561_v39 = vor.u32 %v763_v31, %v760_v19  ;;  %v2082_v8 = vld [vmem:[%s2353_s30 + $0x38] sm:$0xff]   ;;  %s1578_s30 = scalar_lea.vmem %s2953_s4, %s2869_s27 }
  0x46   : > { %v1144_v21 = vsel %vm571_vm7, %v1135_v16, %v2553_v32  ;;  %829 = vrot.lane.b32.xlu1 %v801_v28, %s2162_s14  ;;  %v592_v36 = vrot.slane %v590_v33, 4  ;;  %v595_v45 = vrot.slane %v593_v10, 5  ;;  %v869_v60 = vsel %vm864_vm2, %v2330_v43, 0  ;;  %1946 = vmatpush3.bf16.msra.mxu0 %v2082_v8 }
  0x47   : > { %1176 = vst.msk [vmem:[#allocation3 + $0x10] sm:$0xff] %vm412_vm1, %v1144_v21  ;;  %v875_v44 = vshrl.u32 %v868_v38, 16  ;;  %v879_v46 = vshrl.u32 %v869_v60, 16  ;;  %v882_v47 = vshll.u32 %v869_v60, 16  ;;  %v765_v48 = vsel %vm617_vm15, %v2507_v37, %v2561_v39  ;;  %1990 = vmatpush3.bf16.msra.mxu1 %v2083_v35 }
  0x48   : > { %v2575_v51 = vor.u32 %v595_v45, %v592_v36  ;;  %vm777_vm4 = vcmp.ne.s16.totalorder %v765_v48, 0  ;;  %v424_v52 = vadd.s32 48, %v2283_v18  ;;  %v425_v55 = vadd.s32 56, %v2283_v18 }
  0x49   : > { %v877_v57 = vrot.slane %v875_v44, 7  ;;  %v2582_v58 = vrot.slane %v879_v46, 7  ;;  %v782_v61 = vsel %vm777_vm4, %v2342_v49, 0  ;;  %v1125_v62 = vsel %vm777_vm4, %v2358_v54, 0 }
  0x4a   : > { %v597_v37 = vsel %vm571_vm7, %v2467_v53, %v2575_v51  ;;  %v803_v34 = vshrl.u32 %v782_v61, 16  ;;  %v806_v0 = vshll.u32 %v782_v61, 16  ;;  %v1146_v1 = vshrl.u32 %v1125_v62, 16 }
  0x4b   : > { %vm609_vm5 = vcmp.ne.s16.totalorder %v597_v37, 0  ;;  %v884_v3 = vor.u32 %v882_v47, %v2582_v58  ;;  %v1149_v6 = vshll.u32 %v1125_v62, 16  ;;  %v472_v7 = vand.u32 7, %v424_v52 }
  0x4c   : > { %v2595_v9 = vsel %vm607_vm0, %v538_v5, 0  ;;  %v1020_v53 = vsel %vm609_vm5, %v2358_v54, 0  ;;  %v805_v11 = vrot.slane %v803_v34, 4  ;;  %v808_v13 = vrot.slane %v806_v0, 5  ;;  %v2651_v34 = vld [vmem:[#allocation2 + $0x30] sm:$0xf] }
  0x4d   : > { %v1041_v16 = vshrl.u32 %v1020_v53, 16  ;;  %v1044_v23 = vshll.u32 %v1020_v53, 16  ;;  %v885_v24 = vsel %vm873_vm14, %v877_v57, %v884_v3  ;;  %v1148_v14 = vrot.slane %v1146_v1, 4 }
  0x4e   : > { %910 = vrot.lane.b32.xlu1 %v885_v24, %s2161_s12  ;;  %v2601_v19 = vor.u32 %v808_v13, %v805_v11  ;;  %v1151_v31 = vrot.slane %v1149_v6, 5  ;;  %v479_v42 = vand.u32 7, %v425_v55  ;;  %vm528_vm0 = vcmp.ne.s32.totalorder %v472_v7, 7 }
  0x4f   : > { %v1043_v17 = vrot.slane %v1041_v16, 3  ;;  %v1046_v28 = vrot.slane %v1044_v23, 4  ;;  %vm718_vm6 = vmpackc.low %vm528_vm0, %vm528_vm0  ;;  %v981_v38 = vshrl.u32 %v2499_v4, 16  ;;  %v856_v21 = vor.u32 %v2545_v22, %v581_v25 }
  0x50   : > { %v810_v36 = vsel %vm571_vm7, %v2547_v30, %v2601_v19  ;;  %v2610_v45 = vor.u32 %v1151_v31, %v1148_v14  ;;  %vm529_vm8 = vcmp.ne.s32.totalorder %v479_v42, 7  ;;  %v726_v60 = vsel %vm718_vm6, 65537, %v2159_v20 }
  0x51   : > { %v2616_v5 = vsel %vm608_vm3, %v2330_v43, 0  ;;  %v2618_v4 = vor.u32 %v1046_v28, %v1043_v17  ;;  %vm719_vm10 = vmpackc.low %vm529_vm8, %vm529_vm8  ;;  %v857_v15 = vrot.slane %v593_v10, 1  ;;  %vm536_vm12 = vcmp.ne.s32.totalorder %v472_v7, 0  ;;  %v1182_v7 = vld [vmem:[#allocation3 + $0x10] sm:$0xff] }
  0x52   : > { %v2624_v25 = vsel %vm609_vm5, %v2342_v49, 0  ;;  %v1153_v22 = vsel %vm571_vm7, %v2553_v32, %v2610_v45  ;;  %831 = vrot.lane.b32.xlu1 %v810_v36, %s2162_s14  ;;  %v727_v43 = vsel %vm719_vm10, 65537, %v2159_v20  ;;  %vm537_vm3 = vcmp.ne.s32.totalorder %v479_v42, 0  ;;  %vm549_vm13 = vmpackc.low %vm536_vm12, %vm536_vm12  ;;  %v674_v32 = vld [vmem:[#allocation2 + $0x28] sm:$0xf]  ;;  %1991 = vmatprep.mubr.msk.bf16.mxu1 %vm412_vm1, %v1182_v7 }
  0x53   : > { %v1048_v26 = vsel %vm617_vm15, %v2516_v40, %v2618_v4  ;;  %1177 = vst.msk [vmem:[#allocation3 + $0x28] sm:$0xff] %vm412_vm1, %v1153_v22  ;;  %v1878_v30 = vcombine.low %v726_v60, %v727_v43  ;;  %v858_v10 = vsel %vm851_vm11, %v856_v21, %v857_v15  ;;  %vm550_vm2 = vmpackc.low %vm537_vm3, %vm537_vm3  ;;  %v557_v44 = vsel %vm549_vm13, 65537, %v2159_v20  ;;  %v939_v42 = vld [vmem:[#allocation2 + $0x30] sm:$0x1] }
  0x54   : > { %1069 = vrot.lane.b32.xlu0 %v1048_v26, %s2162_s14  ;;  %v2639_v46 = vor.u32 %v981_v38, %v2518_v41  ;;  %vm865_vm4 = vcmp.ne.s16.totalorder %v858_v10, 0  ;;  %v558_v47 = vsel %vm550_vm2, 65537, %v2159_v20  ;;  %v1098_v40 = vrot.slane %v2424_v12, 4 }
  0x55   : > { %v767_v48 = vshrl.u32 %v1878_v30, 16  ;;  %v770_v52 = vshll.u32 %v1878_v30, 16  ;;  %v870_v55 = vsel %vm865_vm4, %v2342_v49, 0  ;;  %v2644_v27 = vcombine.low %v557_v44, %v558_v47 }
  0x56   : > { %v887_v56 = vshrl.u32 %v870_v55, 16  ;;  %v890_v57 = vshll.u32 %v870_v55, 16  ;;  %v859_v61 = vor.u32 %v857_v15, %v590_v33  ;;  %v688_v62 = vrot.slane %v674_v32, 4 }
  0x57   : > { %v948_v41 = vrot.slane %v767_v48, 7  ;;  %v599_v63 = vshrl.u32 %v2644_v27, 16  ;;  %v602_v20 = vshll.u32 %v2644_v27, 16  ;;  %v769_v37 = vrot.slane %v767_v48, 3 }
  0x58   : > { %v2653_v0 = vrot.slane %v887_v56, 7  ;;  %v772_v49 = vrot.slane %v770_v52, 4  ;;  %v2659_v1 = vsel %vm680_vm9, %v2380_v59, %v1098_v40  ;;  %v2663_v29 = vsel %vm680_vm9, %v2380_v59, %v688_v62  ;;  %v1017_v62 = vld [vmem:[#allocation2 + $0x30] sm:$0xf] }
  0x59   : > { %v949_v33 = vor.u32 %v948_v41, %v770_v52  ;;  %v601_v2 = vrot.slane %v599_v63, 4  ;;  %v604_v3 = vrot.slane %v602_v20, 5  ;;  %v2667_v6 = vrot.slane %v602_v20, 1 }
  0x5a   : > { %v892_v8 = vor.u32 %v890_v57, %v2653_v0  ;;  %v2670_v53 = vor.u32 %v772_v49, %v769_v37  ;;  %vm955_vm5 = vcmp.ne.s16.totalorder %v948_v41, 0  ;;  %v1100_v11 = vrot.slane %v2651_v34, 4  ;;  %v1185_v59 = vld [vmem:[#allocation3 + $0x28] sm:$0xff] }
  0x5b   : > { %v950_v13 = vsel %vm873_vm14, %v2465_v50, %v949_v33  ;;  %v2676_v16 = vor.u32 %v604_v3, %v601_v2  ;;  %v861_v23 = vsel %vm851_vm11, %v859_v61, %v2667_v6  ;;  %v619_v24 = vshrl.u32 %v2595_v9, 16  ;;  %1992 = vmatmul.mubr.msk.bf16.vlgmr.msra.gmra.mrb[0].mxu1 %vm412_vm1, %v1185_v59  ;;  %v542_v3 = vld [vmem:[#allocation2 + $0x28] sm:$0xf] }
  0x5c   : > { %vm954_vm0 = vcmp.ne.s16.totalorder %v950_v13, 0  ;;  %v893_v14 = vsel %vm873_vm14, %v2582_v58, %v892_v8  ;;  %v774_v31 = vsel %vm617_vm15, %v2561_v39, %v2670_v53  ;;  %vm866_vm6 = vcmp.ne.s16.totalorder %v861_v23, 0  ;;  %v1122_v23 = vld [vmem:[#allocation2 + $0x30] sm:$0x1f] }
  0x5d   : > { %v959_v50 = vsel %vm954_vm0, %v2424_v12, 0  ;;  %912 = vrot.lane.b32.xlu1 %v893_v14, %s2161_s12  ;;  %v606_v17 = vsel %vm571_vm7, %v2575_v51, %v2676_v16  ;;  %vm778_vm8 = vcmp.ne.s16.totalorder %v774_v31, 0  ;;  %v871_v28 = vsel %vm866_vm6, %v2358_v54, 0 }
  0x5e   : > { %v985_v38 = vshll.u32 %v959_v50, 16  ;;  %vm610_vm10 = vcmp.ne.s16.totalorder %v606_v17, 0  ;;  %v783_v58 = vsel %vm778_vm8, %v2358_v54, 0  ;;  %v1126_v21 = vsel %vm778_vm8, %v2424_v12, 0 }
  0x5f   : > { %v1021_v39 = vsel %vm610_vm10, %v2424_v12, 0  ;;  %v812_v36 = vshrl.u32 %v783_v58, 16  ;;  %v815_v60 = vshll.u32 %v783_v58, 16  ;;  %v960_v15 = vsel %vm955_vm5, %v939_v42, 0 }
  0x60   : > { %v987_v22 = vrot.slane %v985_v38, 1  ;;  %v1050_v43 = vshrl.u32 %v1021_v39, 16  ;;  %v1053_v26 = vshll.u32 %v1021_v39, 16  ;;  %v1155_v51 = vshrl.u32 %v1126_v21, 16 }
  0x61   : > { %v814_v30 = vrot.slane %v812_v36, 4  ;;  %v817_v10 = vrot.slane %v815_v60, 5  ;;  %v1158_v44 = vshll.u32 %v1126_v21, 16  ;;  %v895_v32 = vshrl.u32 %v871_v28, 16 }
  0x62   : > { %v988_v47 = vsel %vm851_vm11, %v2639_v46, %v987_v22  ;;  %v1052_v48 = vrot.slane %v1050_v43, 3  ;;  %v1055_v52 = vrot.slane %v1053_v26, 4  ;;  %v1157_v55 = vrot.slane %v1155_v51, 4 }
  0x63   : > { %1001 = vrot.lane.b32.xlu0 %v988_v47, %s2160_s11  ;;  %v2701_v35 = vor.u32 %v817_v10, %v814_v30  ;;  %v1160_v56 = vrot.slane %v1158_v44, 5  ;;  %v2703_v57 = vrot.slane %v895_v32, 7  ;;  %v898_v61 = vshll.u32 %v871_v28, 16 }
  0x64   : > { %v1056_v41 = vor.u32 %v1055_v52, %v1052_v48  ;;  %v989_v20 = vshrl.u32 %v959_v50, 16  ;;  %v993_v37 = vshll.u32 %v960_v15, 16  ;;  %vm611_vm12 = vcmp.ne.s16.totalorder %v2676_v16, 0 }
  0x65   : > { %v2708_v46 = vsel %vm610_vm10, %v2358_v54, 0  ;;  %v819_v49 = vsel %vm571_vm7, %v2601_v19, %v2701_v35  ;;  %v1161_v33 = vor.u32 %v1160_v56, %v1157_v55  ;;  %v900_v2 = vor.u32 %v898_v61, %v2703_v57  ;;  %v711_v54 = vld [vmem:[#allocation2 + $0x28] sm:$0x1f] }
  0x66   : > { %v1057_v7 = vsel %vm617_vm15, %v2618_v4, %v1056_v41  ;;  %833 = vrot.lane.b32.xlu1 %v819_v49, %s2162_s14  ;;  %v991_v8 = vor.u32 %v989_v20, %v987_v22  ;;  %v995_v59 = vrot.slane %v993_v37, 1  ;;  %v1022_v13 = vsel %vm611_vm12, %v1017_v62, 0 }
  0x67   : > { %1071 = vrot.lane.b32.xlu0 %v1057_v7, %s2162_s14  ;;  %v1162_v19 = vsel %vm571_vm7, %v2610_v45, %v1161_v33  ;;  %v901_v14 = vsel %vm873_vm14, %v2653_v0, %v900_v2  ;;  %v1059_v31 = vshrl.u32 %v1022_v13, 16  ;;  %v1062_v42 = vshll.u32 %v1022_v13, 16 }
  0x68   : > { %1178 = vst.msk [vmem:[#allocation3 + $0x40] sm:$0xff] %vm412_vm1, %v1162_v19  ;;  %v996_v4 = vsel %vm851_vm11, %v991_v8, %v995_v59  ;;  %v2728_v50 = vsel %vm611_vm12, %v542_v3, 0  ;;  %vm779_vm3 = vcmp.ne.s16.totalorder %v2670_v53, 0  ;;  %v862_v17 = vor.u32 %v2667_v6, %v599_v63 }
  0x69   : > { %v1061_v45 = vrot.slane %v1059_v31, 3  ;;  %v1064_v28 = vrot.slane %v1062_v42, 4  ;;  %v784_v38 = vsel %vm779_vm3, %v711_v54, 0  ;;  %v1127_v0 = vsel %vm779_vm3, %v1122_v23, 0 }
  0x6a   : > { %914 = vrot.lane.b32.xlu1 %v901_v14, %s2161_s12  ;;  %v821_v58 = vshrl.u32 %v784_v38, 16  ;;  %v824_v21 = vshll.u32 %v784_v38, 16  ;;  %v1164_v39 = vshrl.u32 %v1127_v0, 16  ;;  %v1167_v36 = vshll.u32 %v1127_v0, 16 }
  0x6b   : > { %1106 = vrot.lane.b32.xlu0 %v2659_v1, %s2161_s12  ;;  %v1065_v16 = vor.u32 %v1064_v28, %v1061_v45  ;;  %vm867_vm11 = vcmp.ne.s16.totalorder %v862_v17, 0  ;;  %v621_v27 = vrot.slane %v619_v24, 3  ;;  %v622_v63 = vshll.u32 %v2595_v9, 16 }
  0x6c   : > { %v823_v6 = vrot.slane %v821_v58, 4  ;;  %v826_v53 = vrot.slane %v824_v21, 5  ;;  %v1166_v60 = vrot.slane %v1164_v39, 4  ;;  %v1169_v15 = vrot.slane %v1167_v36, 5 }
  0x6d   : > { %v1066_v22 = vsel %vm617_vm15, %v1056_v41, %v1065_v16  ;;  %v872_v43 = vsel %vm867_vm11, %v2424_v12, 0  ;;  %v624_v26 = vrot.slane %v622_v63, 4  ;;  %v627_v51 = vshrl.u32 %v2616_v5, 16 }
  0x6e   : > { %696 = vrot.lane.b32.xlu1 %v2663_v29, %s2160_s11  ;;  %v827_v1 = vor.u32 %v826_v53, %v823_v6  ;;  %v1170_v30 = vor.u32 %v1169_v15, %v1166_v60  ;;  %v903_v10 = vshrl.u32 %v872_v43, 16  ;;  %v906_v24 = vshll.u32 %v872_v43, 16 }
  0x6f   : > { %1003 = vrot.lane.b32.xlu0 %v996_v4, %s2160_s11  ;;  %v625_v9 = vor.u32 %v624_v26, %v621_v27  ;;  %v629_v44 = vrot.slane %v627_v51, 3  ;;  %v630_v32 = vshll.u32 %v2616_v5, 16  ;;  %v636_v47 = vshrl.u32 %v2624_v25, 16  ;;  %v1188_v48 = vld [vmem:[#allocation3 + $0x40] sm:$0xff]  ;;  %s1604_s11 = scalar_lea.vmem %s2956_s7, %s2140_s13 }
  0x70   : > { %v828_v52 = vsel %vm571_vm7, %v2701_v35, %v827_v1  ;;  %v1171_v55 = vsel %vm571_vm7, %v1161_v33, %v1170_v30  ;;  %v905_v56 = vrot.slane %v903_v10, 7  ;;  %v639_v29 = vshll.u32 %v2624_v25, 16  ;;  %1995 = vmatprep.mubr.msk.bf16.mxu1 %vm412_vm1, %v1188_v48 }
  0x71   : > { %1179 = vst.msk [vmem:[#allocation3 + $0x58] sm:$0xff] %vm412_vm1, %v1171_v55  ;;  %v632_v61 = vrot.slane %v630_v32, 4  ;;  %v638_v62 = vrot.slane %v636_v47, 3  ;;  %v645_v41 = vshrl.u32 %v2708_v46, 16  ;;  %v648_v5 = vshll.u32 %v2708_v46, 16 }
  0x72   : > { %835 = vrot.lane.b32.xlu1 %v828_v52, %s2162_s14  ;;  %v908_v20 = vor.u32 %v906_v24, %v905_v56  ;;  %v641_v37 = vrot.slane %v639_v29, 4  ;;  %v654_v25 = vshrl.u32 %v2728_v50, 16  ;;  %v1101_v2 = vsel %vm680_vm9, %v1098_v40, %v1100_v11 }
  0x73   : > { %1073 = vrot.lane.b32.xlu0 %v1066_v22, %s2162_s14  ;;  %v633_v35 = vor.u32 %v632_v61, %v629_v44  ;;  %v647_v49 = vrot.slane %v645_v41, 3  ;;  %v650_v33 = vrot.slane %v648_v5, 4  ;;  %v657_v7 = vshll.u32 %v2728_v50, 16  ;;  %v2810_v41 = vld [vmem:[%s1231_s22] ss:$0 sm:$0xff]  ;;  %s1585_s14 = scalar_lea.vmem %s2954_s5, %s2869_s27 }
  0x74   : > { %v909_v46 = vsel %vm873_vm14, %v2703_v57, %v908_v20  ;;  %v642_v3 = vor.u32 %v641_v37, %v638_v62  ;;  %v656_v13 = vrot.slane %v654_v25, 3  ;;  %vm702_vm9 = vcmask 523520  }
  0x75   : > { %v634_v8 = vsel %vm617_vm15, %v625_v9, %v633_v35  ;;  %v651_v59 = vor.u32 %v650_v33, %v647_v49  ;;  %v659_v54 = vrot.slane %v657_v7, 4  ;;  %vm841_vm14 = vcmask 785920  }
  0x76   : > { %916 = vrot.lane.b32.xlu1 %v909_v46, %s2161_s12  ;;  %666 = vst.msk [vmem:[#allocation3] sm:$0xff] %vm412_vm1, %v634_v8  ;;  %v643_v34 = vsel %vm617_vm15, %v633_v35, %v642_v3  ;;  %vm922_vm7 = vcmask 1048320   ;;  %vm1553_vm5 = vcmask 785408   ;;  %vm1581_vm12 = vcmask 783360  }
  0x77   : > { %1108 = vrot.lane.b32.xlu0 %v1101_v2, %s2161_s12  ;;  %667 = vst.msk [vmem:[#allocation3 + $0x18] sm:$0xff] %vm412_vm1, %v643_v34  ;;  %v652_v12 = vsel %vm617_vm15, %v642_v3, %v651_v59  ;;  %v660_v40 = vor.u32 %v659_v54, %v656_v13 }
  0x78   : > { %668 = vst.msk [vmem:[#allocation3 + $0x30] sm:$0xff] %vm412_vm1, %v652_v12  ;;  %v1191_v11 = vld [vmem:[#allocation3 + $0x58] sm:$0xff] }
  0x79   : > { %1996 = vmatmul.mubr.msk.bf16.gmra.mrb[4].mxu1 %vm412_vm1, %v1191_v11  ;;  %v661_v57 = vsel %vm617_vm15, %v651_v59, %v660_v40 }
  0x7a   : > { %669 = vst.msk [vmem:[#allocation3 + $0x48] sm:$0xff] %vm412_vm1, %v661_v57 }
  0x9c   : > { %v691_v23 = vpop.permute.xlu0 %690 }
  0x9d   : > { %703 = vst.msk [vmem:[#allocation3] sm:$0xff] %vm702_vm9, %v691_v23  ;;  %v693_v19 = vpop.permute.xlu1 %692 }
  0x9e   : > { %704 = vst.msk [vmem:[#allocation3 + $0x18] sm:$0xff] %vm702_vm9, %v693_v19 }
  0xa0   : > { %v1103_v14 = vpop.permute.xlu0 %1102 }
  0xa1   : > { %v695_v31 = vpop.permute.xlu1 %694 }
  0xa2   : > { %705 = vst.msk [vmem:[#allocation3 + $0x30] sm:$0xff] %vm702_vm9, %v695_v31 }
  0xa4   : > { %v1105_v42 = vpop.permute.xlu0 %1104 }
  0xa9   : > { %v998_v4 = vpop.permute.xlu0 %997 }
  0xaa   : > { %1009 = vst.msk [vmem:[#allocation3 + $0x8] sm:$0xff] %vm702_vm9, %v998_v4 }
  0xb0   : > { %v1068_v50 = vpop.permute.xlu1 %1067  ;;  %v1000_v17 = vpop.permute.xlu0 %999 }
  0xb1   : > { %1079 = vst.msk [vmem:[#allocation3 + $0x8] sm:$0xff] %vm841_vm14, %v1068_v50 }
  0xb2   : > { %1010 = vst.msk [vmem:[#allocation3 + $0x20] sm:$0xff] %vm702_vm9, %v1000_v17 }
  0xb3   : > { %1114 = vst.msk [vmem:[#allocation3 + $0x8] sm:$0xff] %vm922_vm7, %v1103_v14 }
  0xb8   : > { %v830_v45 = vpop.permute.xlu1 %829 }
  0xb9   : > { %842 = vst.msk [vmem:[#allocation3] sm:$0xff] %vm841_vm14, %v830_v45 }
  0xba   : > { %v1181_v28 = vld [vmem:[#allocation3 + $0x8] sm:$0xff] }
  0xbb   : > { %1391 = vmatprep.mubr.bf16.mxu0 %v1181_v28 }
  0xc0   : > { %v911_v38 = vpop.permute.xlu1 %910 }
  0xc1   : > { %923 = vst.msk [vmem:[#allocation3] sm:$0xff] %vm922_vm7, %v911_v38 }
  0xc4   : > { %v832_v0 = vpop.permute.xlu1 %831 }
  0xc5   : > { %843 = vst.msk [vmem:[#allocation3 + $0x18] sm:$0xff] %vm841_vm14, %v832_v0 }
  0xc6   : > { %v1070_v58 = vpop.permute.xlu0 %1069 }
  0xc7   : > { %1080 = vst.msk [vmem:[#allocation3 + $0x20] sm:$0xff] %vm841_vm14, %v1070_v58 }
  0xc8   : > { %1115 = vst.msk [vmem:[#allocation3 + $0x20] sm:$0xff] %vm922_vm7, %v1105_v42  ;;  %v1180_v21 = vld [vmem:[#allocation3] sm:$0xff] }
  0xc9   : > { %1392 = vmatmul.mubr.bf16.vlgmr.msra.gmra.mrb[0].mxu0 %v1180_v21 }
  0xcf   : > { %v913_v39 = vpop.permute.xlu1 %912  ;;  %v1184_v36 = vld [vmem:[#allocation3 + $0x20] sm:$0xff] }
  0xd0   : > { %924 = vst.msk [vmem:[#allocation3 + $0x18] sm:$0xff] %vm922_vm7, %v913_v39  ;;  %1399 = vmatprep.mubr.bf16.mxu0 %v1184_v36 }
  0xd5   : > { %v1002_v16 = vpop.permute.xlu0 %1001 }
  0xd6   : > { %1011 = vst.msk [vmem:[#allocation3 + $0x38] sm:$0xff] %vm702_vm9, %v1002_v16 }
  0xd7   : > { %v1183_v27 = vld [vmem:[#allocation3 + $0x18] sm:$0xff] }
  0xd8   : > { %v834_v63 = vpop.permute.xlu1 %833  ;;  %1400 = vmatmul.mubr.bf16.gmra.mrb[4].mxu0 %v1183_v27 }
  0xd9   : > { %v1072_v6 = vpop.permute.xlu0 %1071  ;;  %844 = vst.msk [vmem:[#allocation3 + $0x30] sm:$0xff] %vm841_vm14, %v834_v63 }
  0xda   : > { %1081 = vst.msk [vmem:[#allocation3 + $0x38] sm:$0xff] %vm841_vm14, %v1072_v6 }
  0xdc   : > { %v915_v53 = vpop.permute.xlu1 %914 }
  0xdd   : > { %v1107_v60 = vpop.permute.xlu0 %1106  ;;  %925 = vst.msk [vmem:[#allocation3 + $0x30] sm:$0xff] %vm922_vm7, %v915_v53 }
  0xde   : > { %1116 = vst.msk [vmem:[#allocation3 + $0x38] sm:$0xff] %vm922_vm7, %v1107_v60 }
  0xe0   : > { %v697_v15 = vpop.permute.xlu1 %696 }
  0xe1   : > { %v1004_v22 = vpop.permute.xlu0 %1003  ;;  %706 = vst.msk [vmem:[#allocation3 + $0x48] sm:$0xff] %vm702_vm9, %v697_v15 }
  0xe2   : > { %1012 = vst.msk [vmem:[#allocation3 + $0x50] sm:$0xff] %vm702_vm9, %v1004_v22 }
  0xe4   : > { %v836_v43 = vpop.permute.xlu1 %835  ;;  %v1186_v26 = vld [vmem:[#allocation3 + $0x30] sm:$0xff] }
  0xe5   : > { %v1074_v51 = vpop.permute.xlu0 %1073  ;;  %845 = vst.msk [vmem:[#allocation3 + $0x48] sm:$0xff] %vm841_vm14, %v836_v43  ;;  %v1187_v1 = vld [vmem:[#allocation3 + $0x38] sm:$0xff] }
  0xe6   : > { %1082 = vst.msk [vmem:[#allocation3 + $0x50] sm:$0xff] %vm841_vm14, %v1074_v51  ;;  %1407 = vmatprep.mubr.bf16.mxu0 %v1187_v1 }
  0xe7   : > { %1408 = vmatmul.mubr.bf16.gmra.mrb[8].mxu0 %v1186_v26 }
  0xe8   : > { %v917_v30 = vpop.permute.xlu1 %916 }
  0xe9   : > { %v1109_v10 = vpop.permute.xlu0 %1108  ;;  %926 = vst.msk [vmem:[#allocation3 + $0x48] sm:$0xff] %vm922_vm7, %v917_v30 }
  0xea   : > { %1117 = vst.msk [vmem:[#allocation3 + $0x50] sm:$0xff] %vm922_vm7, %v1109_v10 }
  0xf0   : > { %v1189_v24 = vld [vmem:[#allocation3 + $0x48] sm:$0xff] }
  0xf1   : > { %v1190_v9 = vld [vmem:[#allocation3 + $0x50] sm:$0xff] }
  0xf2   : > { %1415 = vmatprep.mubr.bf16.mxu0 %v1190_v9 }
  0xf3   : > { %1416 = vmatmul.mubr.bf16.gmra.mrb[12].mxu0 %v1189_v24 }
 0x12e   : > { %v1993_v44 = vpop.f32.mrb[0].mxu1 }
 0x12f   : > { %v1458_v32 = vpop.f32.mrb[1].mxu1 }
 0x130   : > { %v1994_v47 = vpop.f32.mrb[2].mxu1 }
 0x131   : > { %v1461_v48 = vpop.f32.mrb[3].mxu1 }
 0x14c   : > { %v2802_v52 = vpop.f32.mrb[4].mxu1 }
 0x14d   : > { %v1474_v55 = vpop.f32.mrb[5].mxu1 }
 0x14e   : > { %v2804_v56 = vpop.f32.mrb[6].mxu1 }
 0x14f   : > { %v1477_v29 = vpop.f32.mrb[7].mxu1 }
 0x19c   : > { %v1947_v61 = vpop.f32.mrb[0].mxu0 }
 0x19d   : > { %v1948_v62 = vpop.f32.mrb[1].mxu0 }
 0x19e   : > { %v1949_v5 = vadd.f32 %v1948_v62, %v1947_v61  ;;  %v1950_v20 = vpop.f32.mrb[2].mxu0  ;;  %v1911_v61 = vld [vmem:[%s1537_s25] ss:$0 sm:$0xff] }
 0x19f   : > { %v1951_v37 = vpop.f32.mrb[3].mxu0 }
 0x1a0   : > { %v1952_v35 = vadd.f32 %v1951_v37, %v1950_v20  ;;  %v1394_v49 = vadd.f32 %v1949_v5, %v2810_v41 }
 0x1a2   : > { %v2813_v33 = vadd.f32 %v1458_v32, %v1394_v49  ;;  %v1397_v25 = vadd.f32 %v1952_v35, %v2810_v41 }
 0x1a4   : > { %v1462_v2 = vadd.f32 %v1461_v48, %v1397_v25  ;;  %v1497_v11 = vmin.f32 %v2813_v33, 0.0  ;;  %vm1489_vm13 = vcmp.gt.f32.partialorder %v2813_v33, 0.0 }
 0x1a6   : > { %v1498_v40 = vmin.f32 %v1462_v2, 0.0  ;;  %v1505_v14 = vmul.f32 1.442695, %v1497_v11  ;;  %vm1490_vm15 = vcmp.gt.f32.partialorder %v1462_v2, 0.0 }
 0x1a8   : > { %v1507_v19 = vmul.f32 1.442695, %v1498_v40 }
 0x1aa   : > { %2090 = vpow2.f32 %v1507_v19 }
 0x1ab   : > { %v1953_v46 = vpop.f32.mrb[4].mxu0  ;;  %2092 = vpow2.f32 %v1505_v14 }
 0x1ac   : > { %v1954_v3 = vpop.f32.mrb[5].mxu0 }
 0x1ad   : > { %v1955_v7 = vadd.f32 %v1954_v3, %v1953_v46  ;;  %v1956_v8 = vpop.f32.mrb[6].mxu0 }
 0x1ae   : > { %v1957_v59 = vpop.f32.mrb[7].mxu0 }
 0x1af   : > { %v1402_v13 = vadd.f32 %v1955_v7, %v2810_v41  ;;  %v1958_v34 = vadd.f32 %v1957_v59, %v1956_v8 }
 0x1b1   : > { %v1467_v54 = vadd.f32 %v1993_v44, %v1402_v13  ;;  %v1405_v12 = vadd.f32 %v1958_v34, %v2810_v41 }
 0x1b3   : > { %v2819_v57 = vadd.f32 %v1994_v47, %v1405_v12  ;;  %v1499_v23 = vmin.f32 %v1467_v54, 0.0  ;;  %vm1491_vm2 = vcmp.gt.f32.partialorder %v1467_v54, 0.0 }
 0x1b4   : > { %v2091_v27 = vpop.eup %2090 }
 0x1b5   : > { %v1509_v31 = vmul.f32 1.442695, %v1499_v23  ;;  %v1500_v42 = vmin.f32 %v2819_v57, 0.0  ;;  %v2093_v53 = vpop.eup %2092  ;;  %v1904_v43 = vadd.f32 -1.0, %v2091_v27  ;;  %vm1492_vm4 = vcmp.gt.f32.partialorder %v2819_v57, 0.0 }
 0x1b6   : > { %v1903_v30 = vadd.f32 -1.0, %v2093_v53 }
 0x1b7   : > { %2094 = vpow2.f32 %v1509_v31  ;;  %v1511_v17 = vmul.f32 1.442695, %v1500_v42  ;;  %v1530_v47 = vsel %vm1490_vm15, %v1462_v2, %v1904_v43 }
 0x1b8   : > { %v2833_v20 = vmul.f32 %v1911_v61, %v1530_v47  ;;  %v2085_v47 = vld [vmem:[%s1631_s23 + $0x8] sm:$0xff]  }
 0x1b9   : > { %2096 = vpow2.f32 %v1511_v17 }
 0x1ba   : > { %v1959_v4 = vpop.f32.mrb[8].mxu0  ;;  %v1555_v7 = vsel %vm1553_vm5, %v2833_v20, 0.0 }
 0x1bb   : > { %v1960_v50 = vpop.f32.mrb[9].mxu0 }
 0x1bc   : > { %v1961_v45 = vadd.f32 %v1960_v50, %v1959_v4  ;;  %v1962_v28 = vpop.f32.mrb[10].mxu0 }
 0x1bd   : > { %v1963_v38 = vpop.f32.mrb[11].mxu0 }
 0x1be   : > { %v1964_v0 = vadd.f32 %v1963_v38, %v1962_v28  ;;  %v1410_v58 = vadd.f32 %v1961_v45, %v2810_v41 }
 0x1c0   : > { %v1475_v21 = vadd.f32 %v1474_v55, %v1410_v58  ;;  %v1413_v39 = vadd.f32 %v1964_v0, %v2810_v41 }
 0x1c1   : > { %v2095_v60 = vpop.eup %2094 }
 0x1c2   : > { %v1501_v36 = vmin.f32 %v1475_v21, 0.0  ;;  %v1478_v16 = vadd.f32 %v1477_v29, %v1413_v39  ;;  %v1905_v10 = vadd.f32 -1.0, %v2095_v60  ;;  %v1529_v29 = vsel %vm1489_vm13, %v2813_v33, %v1903_v30 }
 0x1c3   : > { %v2097_v9 = vpop.eup %2096  ;;  %v2837_v25 = vmul.f32 %v1911_v61, %v1529_v29  ;;  %vm1493_vm0 = vcmp.gt.f32.partialorder %v1475_v21, 0.0  ;;  %v2088_v29 = vld [vmem:[%s1631_s23 + $0x20] sm:$0xff]  }
 0x1c4   : > { %v1513_v63 = vmul.f32 1.442695, %v1501_v36  ;;  %v1502_v6 = vmin.f32 %v1478_v16, 0.0  ;;  %v1531_v62 = vsel %vm1491_vm2, %v1467_v54, %v1905_v10  ;;  %v1906_v5 = vadd.f32 -1.0, %v2097_v9  ;;  %v1586_v10 = vld [vmem:[%s1585_s14] sm:$0x3f]  ;;  %s1644_s14 = scalar_lea.vmem %s2958_s9, %s2140_s13 }
 0x1c5   : > { %v2839_v2 = vmul.f32 %v1911_v61, %v1531_v62  ;;  %v1554_v13 = vsel %vm1553_vm5, %v2837_v25, 0.0  ;;  %vm1494_vm6 = vcmp.gt.f32.partialorder %v1478_v16, 0.0  ;;  %v1590_v62 = vld [vmem:[%s1589_s28] sm:$0x3f] }
 0x1c6   : > { %2098 = vpow2.f32 %v1513_v63  ;;  %v1515_v15 = vmul.f32 1.442695, %v1502_v6  ;;  %v1965_v22 = vpop.f32.mrb[12].mxu0  ;;  %v1556_v12 = vadd.f32 %v1555_v7, %v1554_v13 }
 0x1c7   : > { %v1966_v26 = vpop.f32.mrb[13].mxu0  ;;  %v1557_v34 = vsel %vm1553_vm5, %v2839_v2, 0.0 }
 0x1c8   : > { %2100 = vpow2.f32 %v1515_v15  ;;  %v1967_v51 = vadd.f32 %v1966_v26, %v1965_v22  ;;  %v1968_v1 = vpop.f32.mrb[14].mxu0  ;;  %v1558_v11 = vadd.f32 %v1557_v34, %v1556_v12  ;;  %v1579_v26 = vld [vmem:[%s1578_s30] sm:$0x3f]  ;;  %v1615_v12 = vsub.s32 0, %v2283_v18 }
 0x1c9   : > { %v1969_v24 = vpop.f32.mrb[15].mxu0 }
 0x1ca   : > { %v1418_v44 = vadd.f32 %v1967_v51, %v2810_v41  ;;  %v1970_v32 = vadd.f32 %v1969_v24, %v1968_v1 }
 0x1cc   : > { %v1483_v48 = vadd.f32 %v2802_v52, %v1418_v44  ;;  %v1421_v55 = vadd.f32 %v1970_v32, %v2810_v41  ;;  %v1532_v41 = vsel %vm1492_vm4, %v2819_v57, %v1906_v5  ;;  %v2084_v32 = vld [vmem:[%s1631_s23] sm:$0xff]  }
 0x1cd   : > { %v2848_v54 = vmul.f32 %v1911_v61, %v1532_v41  ;;  %1999 = vmatprep.subr.bf16.mxu1 %v2084_v32 }
 0x1ce   : > { %v1503_v37 = vmin.f32 %v1483_v48, 0.0  ;;  %v1486_v35 = vadd.f32 %v2804_v56, %v1421_v55  ;;  %vm1495_vm8 = vcmp.gt.f32.partialorder %v1483_v48, 0.0  ;;  %2000 = vmatpush3.bf16.msra.mxu1 %v2084_v32  ;;  %v2087_v55 = vld [vmem:[%s1631_s23 + $0x18] sm:$0xff]  }
 0x1cf   : > { %v1559_v23 = vsel %vm1553_vm5, %v2848_v54, 0.0  ;;  %2001 = vmatprep.subr.bf16.mxu1 %v2085_v47 }
 0x1d0   : > { %v2099_v49 = vpop.eup %2098  ;;  %v1517_v52 = vmul.f32 1.442695, %v1503_v37  ;;  %v1504_v46 = vmin.f32 %v1486_v35, 0.0  ;;  %v1560_v31 = vadd.f32 %v1559_v23, %v1558_v11  ;;  %vm1496_vm10 = vcmp.gt.f32.partialorder %v1486_v35, 0.0 }
 0x1d1   : > { %v1907_v33 = vadd.f32 -1.0, %v2099_v49 }
 0x1d2   : > { %v2101_v3 = vpop.eup %2100  ;;  %2102 = vpow2.f32 %v1517_v52  ;;  %v1519_v56 = vmul.f32 1.442695, %v1504_v46  ;;  %2002 = vmatpush3.bf16.msra.mxu1 %v2085_v47 }
 0x1d3   : > { %v1533_v8 = vsel %vm1493_vm0, %v1475_v21, %v1907_v33  ;;  %v1908_v59 = vadd.f32 -1.0, %v2101_v3  ;;  %v1605_v3 = vld [vmem:[%s1604_s11] sm:$0x1] }
 0x1d4   : > { %2104 = vpow2.f32 %v1519_v56  ;;  %v2850_v40 = vmul.f32 %v1911_v61, %v1533_v8 }
 0x1d5   : > { %v1534_v57 = vsel %vm1494_vm6, %v1478_v16, %v1908_v59 }
 0x1d6   : > { %v1561_v19 = vsel %vm1553_vm5, %v2850_v40, 0.0  ;;  %v2856_v14 = vmul.f32 %v1911_v61, %v1534_v57 }
 0x1d7   : > { %v1562_v4 = vadd.f32 %v1561_v19, %v1560_v31 }
 0x1d8   : > { %v1563_v45 = vsel %vm1553_vm5, %v2856_v14, 0.0 }
 0x1d9   : > { %v1564_v58 = vadd.f32 %v1563_v45, %v1562_v4 }
 0x1dc   : > { %v2103_v42 = vpop.eup %2102 }
 0x1dd   : > { %v1909_v50 = vadd.f32 -1.0, %v2103_v42 }
 0x1de   : > { %v2105_v17 = vpop.eup %2104 }
 0x1df   : > { %v1535_v28 = vsel %vm1495_vm8, %v1483_v48, %v1909_v50  ;;  %v1910_v38 = vadd.f32 -1.0, %v2105_v17  ;;  %v2086_v48 = vld [vmem:[%s1631_s23 + $0x10] sm:$0xff]  }
 0x1e0   : > { %v2860_v0 = vmul.f32 %v1911_v61, %v1535_v28  ;;  %2003 = vmatprep.subr.bf16.mxu1 %v2086_v48 }
 0x1e1   : > { %v1536_v21 = vsel %vm1496_vm10, %v1486_v35, %v1910_v38  ;;  %2004 = vmatpush3.bf16.msra.mxu1 %v2086_v48  ;;  %v2116_v48 = vld [vmem:[%s2256_s26 + $0x38] sm:$0xff] }
 0x1e2   : > { %v1565_v39 = vsel %vm1553_vm5, %v2860_v0, 0.0  ;;  %v2864_v36 = vmul.f32 %v1911_v61, %v1536_v21  ;;  %2005 = vmatprep.subr.bf16.mxu1 %v2087_v55  ;;  %v2089_v61 = vld [vmem:[%s1631_s23 + $0x28] sm:$0xff]  }
 0x1e3   : > { %v1566_v16 = vadd.f32 %v1565_v39, %v1564_v58  ;;  %v2110_v58 = vld [vmem:[%s2256_s26 + $0x10] sm:$0xff] }
 0x1e4   : > { %v1567_v27 = vsel %vm1553_vm5, %v2864_v36, 0.0 }
 0x1e5   : > { %v1568_v63 = vadd.f32 %v1567_v27, %v1566_v16  ;;  %2006 = vmatpush3.bf16.msra.mxu1 %v2087_v55  ;;  %v2111_v16 = vld [vmem:[%s2256_s26] sm:$0xff] }
 0x1e6   : > { %2007 = vmatprep.subr.bf16.mxu1 %v2088_v29 }
 0x1e7   : > { %v1569_v6 = vrot.slane %v1568_v63, 4 }
 0x1e9   : > { %v1570_v53 = vadd.f32 %v1569_v6, %v1568_v63  ;;  %2008 = vmatpush3.bf16.msra.mxu1 %v2088_v29  ;;  %v2112_v6 = vld [vmem:[%s2256_s26 + $0x18] sm:$0xff]  ;;  %v2117_v29 = vld [vmem:[%s2256_s26 + $0x28] sm:$0xff] }
 0x1ea   : > { %2009 = vmatprep.subr.bf16.mxu1 %v2089_v61 }
 0x1eb   : > { %v1571_v60 = vrot.slane %v1570_v53, 2 }
 0x1ed   : > { %v1572_v15 = vadd.f32 %v1571_v60, %v1570_v53  ;;  %2010 = vmatpush3.bf16.msra.mxu1 %v2089_v61  ;;  %v2113_v60 = vld [vmem:[%s2256_s26 + $0x8] sm:$0xff] }
 0x1ef   : > { %v1573_v22 = vrot.slane %v1572_v15, 1 }
 0x1f1   : > { %v1574_v43 = vadd.f32 %v1573_v22, %v1572_v15 }
 0x1f3   : > { %v1576_v51 = vmul.f32 0.015625, %v1574_v43 }
 0x1f5   : > { %v1580_v1 = vmul.f32 %v1579_v26, %v1576_v51 }
 0x1f7   : > { %v1582_v30 = vsel %vm1581_vm12, %v1580_v1, 0.0 }
 0x1f8   : > { %1583 = vadd.xlane.f32.xlu0 %v1582_v30  ;;  %v2114_v30 = vld [vmem:[%s2256_s26 + $0x30] sm:$0xff] }
 0x285   : > { %v1584_v24 = vpop.xlane.xlu0 %1583 }
 0x286   : > { %v1587_v9 = vadd.f32 %v1586_v10, %v1584_v24 }
 0x288   : > { %v1588_v44 = vmax.f32 %v1587_v9, 0.0 }
 0x28a   : > { %1593 = vperm.xlu1 %2064, %v1588_v44   ;;  %v2115_v44 = vld [vmem:[%s2256_s26 + $0x20] sm:$0xff] }
 0x309   : > { %v1594_v5 = vpop.permute.xlu1 %1593 }
 0x30a   : > { %v1596_v37 = vmul.f32 %v1594_v5, %v1590_v62 }
 0x30c   : > { %v1597_v35 = vsel %vm1581_vm12, %v1596_v37, 0.0 }
 0x30d   : > { %v1598_v49 = vrot.slane %v1597_v35, 4 }
 0x30f   : > { %v1599_v52 = vadd.f32 %v1598_v49, %v1597_v35 }
 0x311   : > { %v1600_v46 = vrot.slane %v1599_v52, 2 }
 0x313   : > { %v1601_v41 = vadd.f32 %v1600_v46, %v1599_v52 }
 0x315   : > { %v1602_v33 = vrot.slane %v1601_v41, 1 }
 0x317   : > { %v1603_v7 = vadd.f32 %v1602_v33, %v1601_v41 }
 0x319   : > { %v1606_v56 = vadd.f32 %v1605_v3, %v1603_v7 }
 0x31b   : > { %v1607_v8 = vsub.f32 0.0, %v1606_v56 }
 0x31d   : > { %v1608_v59 = vmul.f32 1.442695, %v1607_v8 }
 0x31f   : > { %2106 = vpow2.f32 %v1608_v59 }
 0x329   : > { %v2107_v13 = vpop.eup %2106 }
 0x32a   : > { %v1610_v34 = vadd.f32 1.0, %v2107_v13 }
 0x32c   : > { %2108 = vrcp.f32 %v1610_v34 }
 0x336   : > { %v2109_v11 = vpop.eup %2108 }
 0x337   : > { %v1616_v57 = vrot.slane %v2109_v11, %v1615_v12 }
 0x339   : > { %v1617_v23 = vmul.f32 %v1616_v57, %v2837_v25  ;;  %v1618_v19 = vmul.f32 %v1616_v57, %v2833_v20  ;;  %v1619_v31 = vmul.f32 %v1616_v57, %v2839_v2  ;;  %v1620_v42 = vmul.f32 %v1616_v57, %v2848_v54  ;;  %v1914_v54 = vld [vmem:[%s1644_s14] ss:$0 sm:$0xff] }
 0x33a   : > { %v1621_v4 = vmul.f32 %v1616_v57, %v2850_v40  ;;  %v1622_v50 = vmul.f32 %v1616_v57, %v2856_v14  ;;  %v1623_v20 = vmul.f32 %v1616_v57, %v2860_v0  ;;  %v1624_v25 = vmul.f32 %v1616_v57, %v2864_v36 }
 0x33b   : > { %v1625_v17 = vpack.c.bf16 %v1618_v19, %v1617_v23  ;;  %v1626_v45 = vpack.c.bf16 %v1620_v42, %v1619_v31 }
 0x33c   : > { %v1627_v18 = vpack.c.bf16 %v1622_v50, %v1621_v4  ;;  %v1628_v2 = vpack.c.bf16 %v1624_v25, %v1623_v20 }
 0x33d   : > { %2011 = vmatprep.mubr.msk.bf16.mxu1 %vm1553_vm5, %v1625_v17 }
 0x33e   : > { %2012 = vmatmul.mubr.msk.bf16.vlgmr.msra.gmra.mrb[8].mxu1 %vm1553_vm5, %v1626_v45 }
 0x33f   : > { %2015 = vmatprep.mubr.msk.bf16.mxu1 %vm1553_vm5, %v1627_v18 }
 0x346   : > { %2016 = vmatmul.mubr.msk.bf16.gmra.mrb[12].mxu1 %vm1553_vm5, %v1628_v2 }
 0x411   : > { %v2013_v40 = vpop.f32.mrb[8].mxu1 }
 0x412   : > { %v1743_v14 = vadd.f32 %v2013_v40, %v1914_v54  ;;  %v1734_v28 = vpop.f32.mrb[9].mxu1 }
 0x413   : > { %v1735_v38 = vadd.f32 %v1914_v54, %v1734_v28  ;;  %v2014_v0 = vpop.f32.mrb[10].mxu1 }
 0x414   : > { %v1767_v21 = vadd.f32 %v2110_v58, %v1743_v14  ;;  %v1746_v39 = vadd.f32 %v2014_v0, %v1914_v54  ;;  %v1737_v36 = vpop.f32.mrb[11].mxu1 }
 0x415   : > { %v1765_v27 = vadd.f32 %v2111_v16, %v1735_v38  ;;  %v1738_v63 = vadd.f32 %v1914_v54, %v1737_v36 }
 0x416   : > { %1775 = vst.msk [vmem:[%s2256_s26 + $0x10] sm:$0xff] %vm412_vm1, %v1767_v21  ;;  %v1768_v53 = vadd.f32 %v2112_v6, %v1746_v39 }
 0x417   : > { %1773 = vst.msk [vmem:[%s2256_s26] sm:$0xff] %vm412_vm1, %v1765_v27  ;;  %v1766_v15 = vadd.f32 %v2113_v60, %v1738_v63 }
 0x418   : > { %1776 = vst.msk [vmem:[%s2256_s26 + $0x18] sm:$0xff] %vm412_vm1, %v1768_v53 }
 0x419   : > { %1774 = vst.msk [vmem:[%s2256_s26 + $0x8] sm:$0xff] %vm412_vm1, %v1766_v15  ;;  %v2017_v22 = vpop.f32.mrb[12].mxu1 }
 0x41a   : > { %v1759_v43 = vadd.f32 %v2017_v22, %v1914_v54  ;;  %v1750_v26 = vpop.f32.mrb[13].mxu1 }
 0x41b   : > { %v1751_v51 = vadd.f32 %v1914_v54, %v1750_v26  ;;  %v2018_v1 = vpop.f32.mrb[14].mxu1 }
 0x41c   : > { %v1771_v10 = vadd.f32 %v2114_v30, %v1759_v43  ;;  %v1762_v24 = vadd.f32 %v2018_v1, %v1914_v54  ;;  %v1753_v9 = vpop.f32.mrb[15].mxu1 }
 0x41d   : > { %v1769_v32 = vadd.f32 %v2115_v44, %v1751_v51  ;;  %v1754_v47 = vadd.f32 %v1914_v54, %v1753_v9 }
 0x41e   : > { %1779 = vst.msk [vmem:[%s2256_s26 + $0x30] sm:$0xff] %vm412_vm1, %v1771_v10  ;;  %v1772_v55 = vadd.f32 %v2116_v48, %v1762_v24 }
 0x41f   : > { %1777 = vst.msk [vmem:[%s2256_s26 + $0x20] sm:$0xff] %vm412_vm1, %v1769_v32  ;;  %v1770_v61 = vadd.f32 %v2117_v29, %v1754_v47 }
 0x420   : > { %1780 = vst.msk [vmem:[%s2256_s26 + $0x38] sm:$0xff] %vm412_vm1, %v1772_v55 }
 0x421   : > { %1778 = vst.msk [vmem:[%s2256_s26 + $0x28] sm:$0xff] %vm412_vm1, %v1770_v61 }
 0x422 PF: > { %s20_s17 = sadd.s32 1, %s2156_s17   ;;  %s2980_s13 = smov %s2148_s15 }
 0x423   : > { %p17_p7 = scmp.ge.s32.totalorder %s20_s17, 6   ;;  %s2981_s14 = smov %s2152_s16 }
 0x424   : > { %s2982_s15 = smov %s2985_s18  ;;  %s2983_s16 = smov %s2989_s19 }
 0x425   :  { %19 = sbr.rel (!%p17_p7) target bundleno = 3 (0x3), region = 103 }

</bundles_post_ra>
